<compile_context>
chip_gen: v7x
topology: tpu7x:2x2x1
jax: 0.10.0
libtpu: 0.0.40
codegen_flags: <defaults>
</compile_context>

<pallas_src>
import functools

import jax
import jax.numpy as jnp
import numpy as np
from jax import lax
from jax.experimental import pallas as pl
from jax.experimental.pallas import tpu as pltpu

STORE_DTYPE = jnp.bfloat16
# bf16 activation inputs: ~2x EUP/VPU rate on v6e/v7x.  (On v5e this only adds
# a cast; set to jnp.float32 there if profiling shows it matters.)
_ACT_DTYPE = jnp.bfloat16
_STATIC_UNROLL_MAX_T = 16


def _stacked_lstm_kernel(xs_ref, w_ref, u_ref, b_ref, hs_ref, cs_ref,
                         xw_sc, h_acc, c_acc, *, T, B, H):
    """One grid step = one LSTM layer over the full sequence.

    Refs:
      xs_ref : (T*B, H)    bf16  original sequence input (read at layer 0 only)
      w_ref  : (1, H, 4H)  bf16  fused input->hidden weights  [Wi|Wf|Wo|Wg]
      u_ref  : (1, H, 4H)  bf16  fused hidden->hidden weights [Ui|Uf|Uo|Ug]
      b_ref  : (1, 1, 4H)  bf16  fused biases                 [bi|bf|bo|bg]
      hs_ref : (1, T*B, H) bf16  this layer's hidden outputs (dense layout)
      cs_ref : (1, T*B, H) bf16  this layer's cell   outputs (dense layout)
      xw_sc  : (T*B, 4H) f32 scratch: hoisted input projection x@W + b
      h_acc  : (T*B, H)  f32 scratch: per-step hiddens; persists across grid
               steps and doubles as the next layer's input sequence
      c_acc  : (T*B, H)  f32 scratch: per-step cell states
    """
    layer = pl.program_id(0)

    w = w_ref[0]                          # (H, 4H) bf16, stays in VMEM
    u = u_ref[0]                          # (H, 4H) bf16, stays in VMEM
    b = b_ref[0].astype(jnp.float32)      # (1, 4H) f32

    # Hoisted, time-independent projection for the whole sequence: one big
    # bf16-in / f32-acc MXU matmul, bias folded in once.
    @pl.when(layer == 0)
    def _():
        xw_sc[...] = (
            jnp.dot(xs_ref[...], w, preferred_element_type=jnp.float32) + b)

    @pl.when(layer > 0)
    def _():
        # Previous layer's f32 hiddens are still resident in h_acc (scratch
        # persists across grid iterations); cast once at the matmul input.
        xw_sc[...] = (
            jnp.dot(h_acc[...].astype(w.dtype), w,
                    preferred_element_type=jnp.float32) + b)

    def step(row0, h_bf, c):
        # gates: (B, 4H) f32.  h == 0 at t == 0 makes the matmul exact there.
        gates = (xw_sc[pl.ds(row0, B), :]
                 + jnp.dot(h_bf, u, preferred_element_type=jnp.float32))
        act = gates.astype(_ACT_DTYPE)
        sig = jax.nn.sigmoid(act[:, :3 * H])        # fused i/f/o sigmoids
        i_g = sig[:, 0 * H:1 * H]
        f_g = sig[:, 1 * H:2 * H]
        o_g = sig[:, 2 * H:3 * H]
        g_g = jnp.tanh(act[:, 3 * H:4 * H])
        c_new = f_g * c + i_g * g_g                 # promotes to f32 (c is f32)
        h_new = o_g * jnp.tanh(c_new)               # f32
        # f32 rows with B == sublane tile 8 -> unmasked stores.
        h_acc[pl.ds(row0, B), :] = h_new
        c_acc[pl.ds(row0, B), :] = c_new
        return h_new.astype(u.dtype), c_new

    h0 = jnp.zeros((B, H), dtype=u.dtype)
    c0 = jnp.zeros((B, H), dtype=jnp.float32)

    if T <= _STATIC_UNROLL_MAX_T:
        h_bf, c = h0, c0
        for t in range(T):                 # statically unrolled (T is small)
            h_bf, c = step(t * B, h_bf, c)
    else:
        def body(t, carry):
            h_bf, c = carry
            row0 = pl.multiple_of(t * B, B)
            return step(row0, h_bf, c)
        lax.fori_loop(0, T, body, (h0, c0), unroll=2)

    # Single dense bulk cast+store of the whole layer's outputs:
    # (T*B, H) bf16 is lane/sublane dense -> unmasked vst, full-width DMA.
    hs_ref[0] = h_acc[...].astype(hs_ref.dtype)
    cs_ref[0] = c_acc[...].astype(cs_ref.dtype)


def _vmem_limit_bytes(T, B, H):
    """Rough scoped-VMEM requirement (scratch + double-buffered weights + IO)."""
    tb = T * B
    f32, bf16 = 4, 2
    scratch = tb * 4 * H * f32 + 2 * tb * H * f32            # xw + h_acc + c_acc
    weights = 2 * (2 * H * 4 * H * bf16) + 2 * (4 * H * bf16)  # W, U, b (x2 bufs)
    io = tb * H * bf16 + 2 * (2 * tb * H * bf16)              # xs + hs/cs (x2 bufs)
    est = scratch + weights + io
    return int(min(max(2 * est, 16 << 20), 64 << 20))


@jax.jit
def stacked_lstm_forward(xs, w_fused, u_fused, b_fused):
    """StackedLSTM.forward.

    xs      : [T, B, H] input sequence (bf16).
    w_fused : [L, H, 4H], u_fused: [L, H, 4H], b_fused: [L, 1, 4H].
    Returns (hiddens, cells): two lists of length L, each element [T, B, H],
    matching the torch module's per-layer stacked hs / cs.
    """
    T, B, H = xs.shape
    L = w_fused.shape[0]
    xs_flat = xs.reshape(T * B, H)

    # Flattened, dense output layout: (L, T*B, H); reshaped back below.
    out_sd = jax.ShapeDtypeStruct((L, T * B, H), xs.dtype)
    kernel = functools.partial(_stacked_lstm_kernel, T=T, B=B, H=H)

    hs_all, cs_all = pl.pallas_call(
        kernel,
        out_shape=(out_sd, out_sd),
        grid_spec=pltpu.PrefetchScalarGridSpec(
            num_scalar_prefetch=0,
            grid=(L,),
            in_specs=[
                pl.BlockSpec((T * B, H), lambda l: (0, 0)),          # xs (resident)
                pl.BlockSpec((1, H, 4 * H), lambda l: (l, 0, 0)),    # W_l
                pl.BlockSpec((1, H, 4 * H), lambda l: (l, 0, 0)),    # U_l
                pl.BlockSpec((1, 1, 4 * H), lambda l: (l, 0, 0)),    # b_l
            ],
            out_specs=[
                pl.BlockSpec((1, T * B, H), lambda l: (l, 0, 0)),    # hs_l
                pl.BlockSpec((1, T * B, H), lambda l: (l, 0, 0)),    # cs_l
            ],
            scratch_shapes=[
                pltpu.VMEM((T * B, 4 * H), jnp.float32),   # hoisted x@W + b
                pltpu.VMEM((T * B, H), jnp.float32),       # h slab / layer carry
                pltpu.VMEM((T * B, H), jnp.float32),       # c slab
            ],
        ),
        compiler_params=pltpu.CompilerParams(
            dimension_semantics=("arbitrary",),   # layers are sequential
            vmem_limit_bytes=_vmem_limit_bytes(T, B, H),
        ),
    )(xs_flat, w_fused, u_fused, b_fused)

    hs_all = hs_all.reshape(L, T, B, H)
    cs_all = cs_all.reshape(L, T, B, H)
    hiddens = [hs_all[l] for l in range(L)]
    cells = [cs_all[l] for l in range(L)]
    return hiddens, cells


def init_stacked_lstm_params(key, hidden_size, num_layers, dtype=STORE_DTYPE):
    """Mirror the torch module init: xavier_normal_ for the 8 weight matrices
    per layer, ones for the 4 biases; gates fused along the last axis
    in order [i, f, o, g]."""
    H = hidden_size
    std = (2.0 / (H + H)) ** 0.5          # xavier_normal std for (H, H)
    ws, us, bs = [], [], []
    for _ in range(num_layers):
        key, kw, ku = jax.random.split(key, 3)
        w = jax.random.normal(kw, (4, H, H), dtype=jnp.float32) * std
        u = jax.random.normal(ku, (4, H, H), dtype=jnp.float32) * std
        w_f = jnp.concatenate([w[g] for g in range(4)], axis=-1).astype(dtype)
        u_f = jnp.concatenate([u[g] for g in range(4)], axis=-1).astype(dtype)
        b_f = jnp.ones((1, 4 * H), dtype=dtype)
        ws.append(w_f)
        us.append(u_f)
        bs.append(b_f)
    return jnp.stack(ws), jnp.stack(us), jnp.stack(bs)


def _reference_forward(xs, w_fused, u_fused, b_fused):
    """Pure-JAX reference mirroring the kernel's numerics
    (bf16 matmul inputs / bf16 activations, f32 accumulation)."""
    T, B, H = xs.shape
    L = w_fused.shape[0]
    hiddens, cells = [], []
    x = xs.reshape(T * B, H)
    for layer in range(L):
        xw = (jnp.dot(x, w_fused[layer], preferred_element_type=jnp.float32)
              + b_fused[layer].astype(jnp.float32)).reshape(T, B, 4 * H)
        h_bf = jnp.zeros((B, H), dtype=xs.dtype)
        c = jnp.zeros((B, H), dtype=jnp.float32)
        hs, cs = [], []
        for t in range(T):
            gates = xw[t] + jnp.dot(h_bf, u_fused[layer],
                                    preferred_element_type=jnp.float32)
            act = gates.astype(_ACT_DTYPE)
            sig = jax.nn.sigmoid(act[:, :3 * H])
            i_g = sig[:, 0 * H:1 * H]
            f_g = sig[:, 1 * H:2 * H]
            o_g = sig[:, 2 * H:3 * H]
            g_g = jnp.tanh(act[:, 3 * H:4 * H])
            c = f_g * c + i_g * g_g
            h = o_g * jnp.tanh(c)
            h_bf = h.astype(xs.dtype)
            hs.append(h)
            cs.append(c)
        hs = jnp.stack(hs)                                  # (T, B, H) f32
        cs = jnp.stack(cs)
        x = hs.reshape(T * B, H).astype(xs.dtype)
        hiddens.append(hs.astype(xs.dtype))
        cells.append(cs.astype(xs.dtype))
    return hiddens, cells


if __name__ == "__main__":
    # Small shapes consistent with the module: [T, B, H] input.
    batch_size = 8
    max_seq_length = 8
    hidden_size = 128
    num_layers = 2

    key = jax.random.PRNGKey(0)
    key, kx = jax.random.split(key)
    xs = jax.random.normal(
        kx, (max_seq_length, batch_size, hidden_size), dtype=jnp.float32
    ).astype(STORE_DTYPE)

    w_fused, u_fused, b_fused = init_stacked_lstm_params(
        key, hidden_size, num_layers)

    hiddens, cells = stacked_lstm_forward(xs, w_fused, u_fused, b_fused)
    jax.block_until_ready((hiddens, cells))

    assert len(hiddens) == num_layers and len(cells) == num_layers
    for h, c in zip(hiddens, cells):
        assert h.shape == (max_seq_length, batch_size, hidden_size)
        assert c.shape == (max_seq_length, batch_size, hidden_size)
        assert h.dtype == STORE_DTYPE and c.dtype == STORE_DTYPE

    # Numerical check against a pure-JAX reference with matching numerics.
    ref_h, ref_c = _reference_forward(xs, w_fused, u_fused, b_fused)
    for hk, hr in zip(hiddens, ref_h):
        np.testing.assert_allclose(np.asarray(hk, np.float32),
                                   np.asarray(hr, np.float32),
                                   atol=2e-2, rtol=2e-2)
    for ck, cr in zip(cells, ref_c):
        np.testing.assert_allclose(np.asarray(ck, np.float32),
                                   np.asarray(cr, np.float32),
                                   atol=2e-2, rtol=2e-2)

    print("KERNEL_OK")
</pallas_src>

<mosaic_0001>
module attributes {stable_mosaic.version = 11 : i64} {
  func.func @_stacked_lstm_kernel(%arg0: i32, %arg1: memref<64x128xbf16, #tpu.memory_space<vmem>>, %arg2: memref<1x128x512xbf16, #tpu.memory_space<vmem>>, %arg3: memref<1x128x512xbf16, #tpu.memory_space<vmem>>, %arg4: memref<1x1x512xbf16, #tpu.memory_space<vmem>>, %arg5: memref<1x64x128xbf16, #tpu.memory_space<vmem>>, %arg6: memref<1x64x128xbf16, #tpu.memory_space<vmem>>, %arg7: memref<64x512xf32, #tpu.memory_space<vmem>>, %arg8: memref<64x128xf32, #tpu.memory_space<vmem>>, %arg9: memref<64x128xf32, #tpu.memory_space<vmem>>) attributes {dimension_semantics = [#tpu.dimension_semantics<arbitrary>], iteration_bounds = array<i64: 2>, scalar_prefetch = 0 : i64, scratch_operands = 3 : i64, tpu.core_type = #tpu.core_type<tc>, window_params = [{pipeline_mode = #tpu.pipeline_mode<synchronous>, transform_indices = @transform_0, window_bounds = array<i64: 64, 128>}, {transform_indices = @transform_1, window_bounds = array<i64: 1, 128, 512>}, {transform_indices = @transform_2, window_bounds = array<i64: 1, 128, 512>}, {transform_indices = @transform_3, window_bounds = array<i64: 1, 1, 512>}, {transform_indices = @transform_4, window_bounds = array<i64: 1, 64, 128>}, {transform_indices = @transform_5, window_bounds = array<i64: 1, 64, 128>}]} {
    %c0 = arith.constant 0 : index
    %c0_0 = arith.constant 0 : index
    %c0_1 = arith.constant 0 : index
    %0 = vector.load %arg2[%c0, %c0_0, %c0_1] : memref<1x128x512xbf16, #tpu.memory_space<vmem>>, vector<1x128x512xbf16>
    %1 = vector.shape_cast %0 : vector<1x128x512xbf16> to vector<128x512xbf16>
    %c0_2 = arith.constant 0 : index
    %c0_3 = arith.constant 0 : index
    %c0_4 = arith.constant 0 : index
    %2 = vector.load %arg3[%c0_2, %c0_3, %c0_4] : memref<1x128x512xbf16, #tpu.memory_space<vmem>>, vector<1x128x512xbf16>
    %3 = vector.shape_cast %2 : vector<1x128x512xbf16> to vector<128x512xbf16>
    %c0_5 = arith.constant 0 : index
    %c0_6 = arith.constant 0 : index
    %c0_7 = arith.constant 0 : index
    %4 = vector.load %arg4[%c0_5, %c0_6, %c0_7] : memref<1x1x512xbf16, #tpu.memory_space<vmem>>, vector<1x1x512xbf16>
    %5 = vector.shape_cast %4 : vector<1x1x512xbf16> to vector<1x512xbf16>
    %6 = arith.extf %5 : vector<1x512xbf16> to vector<1x512xf32>
    %c0_i32 = arith.constant 0 : i32
    %7 = arith.cmpi eq, %arg0, %c0_i32 : i32
    %8 = arith.extui %7 : i1 to i32
    %c0_i32_8 = arith.constant 0 : i32
    %9 = arith.cmpi ne, %8, %c0_i32_8 : i32
    scf.if %9 {
      %c0_79 = arith.constant 0 : index
      %c0_80 = arith.constant 0 : index
      %232 = vector.load %arg1[%c0_79, %c0_80] : memref<64x128xbf16, #tpu.memory_space<vmem>>, vector<64x128xbf16>
      %cst_81 = arith.constant dense<0.000000e+00> : vector<64x512xf32>
      %233 = tpu.matmul %232, %1, %cst_81 {dimension_numbers = #tpu.dot_dimension_numbers<[1], [0], [0], [1], [0, 0, 1, 1], [], []>} : vector<64x128xbf16>, vector<128x512xbf16>, vector<64x512xf32> -> vector<64x512xf32>
      %234 = vector.broadcast %6 : vector<1x512xf32> to vector<64x512xf32>
      %235 = arith.addf %233, %234 : vector<64x512xf32>
      %c0_82 = arith.constant 0 : index
      %c0_83 = arith.constant 0 : index
      %236 = vector.load %arg7[%c0_82, %c0_83] : memref<64x512xf32, #tpu.memory_space<vmem>>, vector<64x512xf32>
      tpu.vector_store %arg7[%c0_82, %c0_83], %235 {strides = array<i32>} : memref<64x512xf32, #tpu.memory_space<vmem>>, vector<64x512xf32>,
    } else {
    }
    %c0_i32_9 = arith.constant 0 : i32
    %10 = arith.cmpi sgt, %arg0, %c0_i32_9 : i32
    %11 = arith.extui %10 : i1 to i32
    %c0_i32_10 = arith.constant 0 : i32
    %12 = arith.cmpi ne, %11, %c0_i32_10 : i32
    scf.if %12 {
      %c0_79 = arith.constant 0 : index
      %c0_80 = arith.constant 0 : index
      %232 = vector.load %arg8[%c0_79, %c0_80] : memref<64x128xf32, #tpu.memory_space<vmem>>, vector<64x128xf32>
      %233 = arith.truncf %232 : vector<64x128xf32> to vector<64x128xbf16>
      %cst_81 = arith.constant dense<0.000000e+00> : vector<64x512xf32>
      %234 = tpu.matmul %233, %1, %cst_81 {dimension_numbers = #tpu.dot_dimension_numbers<[1], [0], [0], [1], [0, 0, 1, 1], [], []>} : vector<64x128xbf16>, vector<128x512xbf16>, vector<64x512xf32> -> vector<64x512xf32>
      %235 = vector.broadcast %6 : vector<1x512xf32> to vector<64x512xf32>
      %236 = arith.addf %234, %235 : vector<64x512xf32>
      %c0_82 = arith.constant 0 : index
      %c0_83 = arith.constant 0 : index
      %237 = vector.load %arg7[%c0_82, %c0_83] : memref<64x512xf32, #tpu.memory_space<vmem>>, vector<64x512xf32>
      tpu.vector_store %arg7[%c0_82, %c0_83], %236 {strides = array<i32>} : memref<64x512xf32, #tpu.memory_space<vmem>>, vector<64x512xf32>,
    } else {
    }
    %cst = arith.constant 0.000000e+00 : bf16
    %13 = vector.broadcast %cst : bf16 to vector<8x128xbf16>
    %cst_11 = arith.constant 0.000000e+00 : f32
    %14 = vector.broadcast %cst_11 : f32 to vector<8x128xf32>
    %c0_12 = arith.constant 0 : index
    %c0_13 = arith.constant 0 : index
    %15 = vector.load %arg7[%c0_12, %c0_13] : memref<64x512xf32, #tpu.memory_space<vmem>>, vector<8x512xf32>
    %cst_14 = arith.constant dense<0.000000e+00> : vector<8x512xf32>
    %16 = tpu.matmul %13, %3, %cst_14 {dimension_numbers = #tpu.dot_dimension_numbers<[1], [0], [0], [1], [0, 0, 1, 1], [], []>} : vector<8x128xbf16>, vector<128x512xbf16>, vector<8x512xf32> -> vector<8x512xf32>
    %17 = arith.addf %15, %16 : vector<8x512xf32>
    %18 = arith.truncf %17 : vector<8x512xf32> to vector<8x512xbf16>
    %19 = vector.extract_strided_slice %18 {offsets = [0, 0], sizes = [8, 384], strides = [1, 1]} : vector<8x512xbf16> to vector<8x384xbf16>
    %20 = arith.negf %19 : vector<8x384xbf16>
    %21 = math.exp %20 : vector<8x384xbf16>
    %cst_15 = arith.constant 1.000000e+00 : bf16
    %22 = vector.broadcast %cst_15 : bf16 to vector<8x384xbf16>
    %23 = arith.addf %22, %21 : vector<8x384xbf16>
    %24 = arith.divf %22, %23 : vector<8x384xbf16>
    %25 = vector.extract_strided_slice %24 {offsets = [0, 0], sizes = [8, 128], strides = [1, 1]} : vector<8x384xbf16> to vector<8x128xbf16>
    %26 = vector.extract_strided_slice %24 {offsets = [0, 128], sizes = [8, 128], strides = [1, 1]} : vector<8x384xbf16> to vector<8x128xbf16>
    %27 = vector.extract_strided_slice %24 {offsets = [0, 256], sizes = [8, 128], strides = [1, 1]} : vector<8x384xbf16> to vector<8x128xbf16>
    %28 = vector.extract_strided_slice %18 {offsets = [0, 384], sizes = [8, 128], strides = [1, 1]} : vector<8x512xbf16> to vector<8x128xbf16>
    %29 = math.tanh %28 : vector<8x128xbf16>
    %30 = arith.extf %26 : vector<8x128xbf16> to vector<8x128xf32>
    %31 = arith.mulf %30, %14 : vector<8x128xf32>
    %32 = arith.mulf %25, %29 : vector<8x128xbf16>
    %33 = arith.extf %32 : vector<8x128xbf16> to vector<8x128xf32>
    %34 = arith.addf %31, %33 : vector<8x128xf32>
    %35 = math.tanh %34 : vector<8x128xf32>
    %36 = arith.extf %27 : vector<8x128xbf16> to vector<8x128xf32>
    %37 = arith.mulf %36, %35 : vector<8x128xf32>
    %c0_16 = arith.constant 0 : index
    %c0_17 = arith.constant 0 : index
    %38 = vector.load %arg8[%c0_16, %c0_17] : memref<64x128xf32, #tpu.memory_space<vmem>>, vector<8x128xf32>
    tpu.vector_store %arg8[%c0_16, %c0_17], %37 {strides = array<i32>} : memref<64x128xf32, #tpu.memory_space<vmem>>, vector<8x128xf32>,
    %c0_18 = arith.constant 0 : index
    %c0_19 = arith.constant 0 : index
    %39 = vector.load %arg9[%c0_18, %c0_19] : memref<64x128xf32, #tpu.memory_space<vmem>>, vector<8x128xf32>
    tpu.vector_store %arg9[%c0_18, %c0_19], %34 {strides = array<i32>} : memref<64x128xf32, #tpu.memory_space<vmem>>, vector<8x128xf32>,
    %40 = arith.truncf %37 : vector<8x128xf32> to vector<8x128xbf16>
    %c8 = arith.constant 8 : index
    %c0_20 = arith.constant 0 : index
    %41 = vector.load %arg7[%c8, %c0_20] : memref<64x512xf32, #tpu.memory_space<vmem>>, vector<8x512xf32>
    %cst_21 = arith.constant dense<0.000000e+00> : vector<8x512xf32>
    %42 = tpu.matmul %40, %3, %cst_21 {dimension_numbers = #tpu.dot_dimension_numbers<[1], [0], [0], [1], [0, 0, 1, 1], [], []>} : vector<8x128xbf16>, vector<128x512xbf16>, vector<8x512xf32> -> vector<8x512xf32>
    %43 = arith.addf %41, %42 : vector<8x512xf32>
    %44 = arith.truncf %43 : vector<8x512xf32> to vector<8x512xbf16>
    %45 = vector.extract_strided_slice %44 {offsets = [0, 0], sizes = [8, 384], strides = [1, 1]} : vector<8x512xbf16> to vector<8x384xbf16>
    %46 = arith.negf %45 : vector<8x384xbf16>
    %47 = math.exp %46 : vector<8x384xbf16>
    %cst_22 = arith.constant 1.000000e+00 : bf16
    %48 = vector.broadcast %cst_22 : bf16 to vector<8x384xbf16>
    %49 = arith.addf %48, %47 : vector<8x384xbf16>
    %50 = arith.divf %48, %49 : vector<8x384xbf16>
    %51 = vector.extract_strided_slice %50 {offsets = [0, 0], sizes = [8, 128], strides = [1, 1]} : vector<8x384xbf16> to vector<8x128xbf16>
    %52 = vector.extract_strided_slice %50 {offsets = [0, 128], sizes = [8, 128], strides = [1, 1]} : vector<8x384xbf16> to vector<8x128xbf16>
    %53 = vector.extract_strided_slice %50 {offsets = [0, 256], sizes = [8, 128], strides = [1, 1]} : vector<8x384xbf16> to vector<8x128xbf16>
    %54 = vector.extract_strided_slice %44 {offsets = [0, 384], sizes = [8, 128], strides = [1, 1]} : vector<8x512xbf16> to vector<8x128xbf16>
    %55 = math.tanh %54 : vector<8x128xbf16>
    %56 = arith.extf %52 : vector<8x128xbf16> to vector<8x128xf32>
    %57 = arith.mulf %56, %34 : vector<8x128xf32>
    %58 = arith.mulf %51, %55 : vector<8x128xbf16>
    %59 = arith.extf %58 : vector<8x128xbf16> to vector<8x128xf32>
    %60 = arith.addf %57, %59 : vector<8x128xf32>
    %61 = math.tanh %60 : vector<8x128xf32>
    %62 = arith.extf %53 : vector<8x128xbf16> to vector<8x128xf32>
    %63 = arith.mulf %62, %61 : vector<8x128xf32>
    %c8_23 = arith.constant 8 : index
    %c0_24 = arith.constant 0 : index
    %64 = vector.load %arg8[%c8_23, %c0_24] : memref<64x128xf32, #tpu.memory_space<vmem>>, vector<8x128xf32>
    tpu.vector_store %arg8[%c8_23, %c0_24], %63 {strides = array<i32>} : memref<64x128xf32, #tpu.memory_space<vmem>>, vector<8x128xf32>,
    %c8_25 = arith.constant 8 : index
    %c0_26 = arith.constant 0 : index
    %65 = vector.load %arg9[%c8_25, %c0_26] : memref<64x128xf32, #tpu.memory_space<vmem>>, vector<8x128xf32>
    tpu.vector_store %arg9[%c8_25, %c0_26], %60 {strides = array<i32>} : memref<64x128xf32, #tpu.memory_space<vmem>>, vector<8x128xf32>,
    %66 = arith.truncf %63 : vector<8x128xf32> to vector<8x128xbf16>
    %c16 = arith.constant 16 : index
    %c0_27 = arith.constant 0 : index
    %67 = vector.load %arg7[%c16, %c0_27] : memref<64x512xf32, #tpu.memory_space<vmem>>, vector<8x512xf32>
    %cst_28 = arith.constant dense<0.000000e+00> : vector<8x512xf32>
    %68 = tpu.matmul %66, %3, %cst_28 {dimension_numbers = #tpu.dot_dimension_numbers<[1], [0], [0], [1], [0, 0, 1, 1], [], []>} : vector<8x128xbf16>, vector<128x512xbf16>, vector<8x512xf32> -> vector<8x512xf32>
    %69 = arith.addf %67, %68 : vector<8x512xf32>
    %70 = arith.truncf %69 : vector<8x512xf32> to vector<8x512xbf16>
    %71 = vector.extract_strided_slice %70 {offsets = [0, 0], sizes = [8, 384], strides = [1, 1]} : vector<8x512xbf16> to vector<8x384xbf16>
    %72 = arith.negf %71 : vector<8x384xbf16>
    %73 = math.exp %72 : vector<8x384xbf16>
    %cst_29 = arith.constant 1.000000e+00 : bf16
    %74 = vector.broadcast %cst_29 : bf16 to vector<8x384xbf16>
    %75 = arith.addf %74, %73 : vector<8x384xbf16>
    %76 = arith.divf %74, %75 : vector<8x384xbf16>
    %77 = vector.extract_strided_slice %76 {offsets = [0, 0], sizes = [8, 128], strides = [1, 1]} : vector<8x384xbf16> to vector<8x128xbf16>
    %78 = vector.extract_strided_slice %76 {offsets = [0, 128], sizes = [8, 128], strides = [1, 1]} : vector<8x384xbf16> to vector<8x128xbf16>
    %79 = vector.extract_strided_slice %76 {offsets = [0, 256], sizes = [8, 128], strides = [1, 1]} : vector<8x384xbf16> to vector<8x128xbf16>
    %80 = vector.extract_strided_slice %70 {offsets = [0, 384], sizes = [8, 128], strides = [1, 1]} : vector<8x512xbf16> to vector<8x128xbf16>
    %81 = math.tanh %80 : vector<8x128xbf16>
    %82 = arith.extf %78 : vector<8x128xbf16> to vector<8x128xf32>
    %83 = arith.mulf %82, %60 : vector<8x128xf32>
    %84 = arith.mulf %77, %81 : vector<8x128xbf16>
    %85 = arith.extf %84 : vector<8x128xbf16> to vector<8x128xf32>
    %86 = arith.addf %83, %85 : vector<8x128xf32>
    %87 = math.tanh %86 : vector<8x128xf32>
    %88 = arith.extf %79 : vector<8x128xbf16> to vector<8x128xf32>
    %89 = arith.mulf %88, %87 : vector<8x128xf32>
    %c16_30 = arith.constant 16 : index
    %c0_31 = arith.constant 0 : index
    %90 = vector.load %arg8[%c16_30, %c0_31] : memref<64x128xf32, #tpu.memory_space<vmem>>, vector<8x128xf32>
    tpu.vector_store %arg8[%c16_30, %c0_31], %89 {strides = array<i32>} : memref<64x128xf32, #tpu.memory_space<vmem>>, vector<8x128xf32>,
    %c16_32 = arith.constant 16 : index
    %c0_33 = arith.constant 0 : index
    %91 = vector.load %arg9[%c16_32, %c0_33] : memref<64x128xf32, #tpu.memory_space<vmem>>, vector<8x128xf32>
    tpu.vector_store %arg9[%c16_32, %c0_33], %86 {strides = array<i32>} : memref<64x128xf32, #tpu.memory_space<vmem>>, vector<8x128xf32>,
    %92 = arith.truncf %89 : vector<8x128xf32> to vector<8x128xbf16>
    %c24 = arith.constant 24 : index
    %c0_34 = arith.constant 0 : index
    %93 = vector.load %arg7[%c24, %c0_34] : memref<64x512xf32, #tpu.memory_space<vmem>>, vector<8x512xf32>
    %cst_35 = arith.constant dense<0.000000e+00> : vector<8x512xf32>
    %94 = tpu.matmul %92, %3, %cst_35 {dimension_numbers = #tpu.dot_dimension_numbers<[1], [0], [0], [1], [0, 0, 1, 1], [], []>} : vector<8x128xbf16>, vector<128x512xbf16>, vector<8x512xf32> -> vector<8x512xf32>
    %95 = arith.addf %93, %94 : vector<8x512xf32>
    %96 = arith.truncf %95 : vector<8x512xf32> to vector<8x512xbf16>
    %97 = vector.extract_strided_slice %96 {offsets = [0, 0], sizes = [8, 384], strides = [1, 1]} : vector<8x512xbf16> to vector<8x384xbf16>
    %98 = arith.negf %97 : vector<8x384xbf16>
    %99 = math.exp %98 : vector<8x384xbf16>
    %cst_36 = arith.constant 1.000000e+00 : bf16
    %100 = vector.broadcast %cst_36 : bf16 to vector<8x384xbf16>
    %101 = arith.addf %100, %99 : vector<8x384xbf16>
    %102 = arith.divf %100, %101 : vector<8x384xbf16>
    %103 = vector.extract_strided_slice %102 {offsets = [0, 0], sizes = [8, 128], strides = [1, 1]} : vector<8x384xbf16> to vector<8x128xbf16>
    %104 = vector.extract_strided_slice %102 {offsets = [0, 128], sizes = [8, 128], strides = [1, 1]} : vector<8x384xbf16> to vector<8x128xbf16>
    %105 = vector.extract_strided_slice %102 {offsets = [0, 256], sizes = [8, 128], strides = [1, 1]} : vector<8x384xbf16> to vector<8x128xbf16>
    %106 = vector.extract_strided_slice %96 {offsets = [0, 384], sizes = [8, 128], strides = [1, 1]} : vector<8x512xbf16> to vector<8x128xbf16>
    %107 = math.tanh %106 : vector<8x128xbf16>
    %108 = arith.extf %104 : vector<8x128xbf16> to vector<8x128xf32>
    %109 = arith.mulf %108, %86 : vector<8x128xf32>
    %110 = arith.mulf %103, %107 : vector<8x128xbf16>
    %111 = arith.extf %110 : vector<8x128xbf16> to vector<8x128xf32>
    %112 = arith.addf %109, %111 : vector<8x128xf32>
    %113 = math.tanh %112 : vector<8x128xf32>
    %114 = arith.extf %105 : vector<8x128xbf16> to vector<8x128xf32>
    %115 = arith.mulf %114, %113 : vector<8x128xf32>
    %c24_37 = arith.constant 24 : index
    %c0_38 = arith.constant 0 : index
    %116 = vector.load %arg8[%c24_37, %c0_38] : memref<64x128xf32, #tpu.memory_space<vmem>>, vector<8x128xf32>
    tpu.vector_store %arg8[%c24_37, %c0_38], %115 {strides = array<i32>} : memref<64x128xf32, #tpu.memory_space<vmem>>, vector<8x128xf32>,
    %c24_39 = arith.constant 24 : index
    %c0_40 = arith.constant 0 : index
    %117 = vector.load %arg9[%c24_39, %c0_40] : memref<64x128xf32, #tpu.memory_space<vmem>>, vector<8x128xf32>
    tpu.vector_store %arg9[%c24_39, %c0_40], %112 {strides = array<i32>} : memref<64x128xf32, #tpu.memory_space<vmem>>, vector<8x128xf32>,
    %118 = arith.truncf %115 : vector<8x128xf32> to vector<8x128xbf16>
    %c32 = arith.constant 32 : index
    %c0_41 = arith.constant 0 : index
    %119 = vector.load %arg7[%c32, %c0_41] : memref<64x512xf32, #tpu.memory_space<vmem>>, vector<8x512xf32>
    %cst_42 = arith.constant dense<0.000000e+00> : vector<8x512xf32>
    %120 = tpu.matmul %118, %3, %cst_42 {dimension_numbers = #tpu.dot_dimension_numbers<[1], [0], [0], [1], [0, 0, 1, 1], [], []>} : vector<8x128xbf16>, vector<128x512xbf16>, vector<8x512xf32> -> vector<8x512xf32>
    %121 = arith.addf %119, %120 : vector<8x512xf32>
    %122 = arith.truncf %121 : vector<8x512xf32> to vector<8x512xbf16>
    %123 = vector.extract_strided_slice %122 {offsets = [0, 0], sizes = [8, 384], strides = [1, 1]} : vector<8x512xbf16> to vector<8x384xbf16>
    %124 = arith.negf %123 : vector<8x384xbf16>
    %125 = math.exp %124 : vector<8x384xbf16>
    %cst_43 = arith.constant 1.000000e+00 : bf16
    %126 = vector.broadcast %cst_43 : bf16 to vector<8x384xbf16>
    %127 = arith.addf %126, %125 : vector<8x384xbf16>
    %128 = arith.divf %126, %127 : vector<8x384xbf16>
    %129 = vector.extract_strided_slice %128 {offsets = [0, 0], sizes = [8, 128], strides = [1, 1]} : vector<8x384xbf16> to vector<8x128xbf16>
    %130 = vector.extract_strided_slice %128 {offsets = [0, 128], sizes = [8, 128], strides = [1, 1]} : vector<8x384xbf16> to vector<8x128xbf16>
    %131 = vector.extract_strided_slice %128 {offsets = [0, 256], sizes = [8, 128], strides = [1, 1]} : vector<8x384xbf16> to vector<8x128xbf16>
    %132 = vector.extract_strided_slice %122 {offsets = [0, 384], sizes = [8, 128], strides = [1, 1]} : vector<8x512xbf16> to vector<8x128xbf16>
    %133 = math.tanh %132 : vector<8x128xbf16>
    %134 = arith.extf %130 : vector<8x128xbf16> to vector<8x128xf32>
    %135 = arith.mulf %134, %112 : vector<8x128xf32>
    %136 = arith.mulf %129, %133 : vector<8x128xbf16>
    %137 = arith.extf %136 : vector<8x128xbf16> to vector<8x128xf32>
    %138 = arith.addf %135, %137 : vector<8x128xf32>
    %139 = math.tanh %138 : vector<8x128xf32>
    %140 = arith.extf %131 : vector<8x128xbf16> to vector<8x128xf32>
    %141 = arith.mulf %140, %139 : vector<8x128xf32>
    %c32_44 = arith.constant 32 : index
    %c0_45 = arith.constant 0 : index
    %142 = vector.load %arg8[%c32_44, %c0_45] : memref<64x128xf32, #tpu.memory_space<vmem>>, vector<8x128xf32>
    tpu.vector_store %arg8[%c32_44, %c0_45], %141 {strides = array<i32>} : memref<64x128xf32, #tpu.memory_space<vmem>>, vector<8x128xf32>,
    %c32_46 = arith.constant 32 : index
    %c0_47 = arith.constant 0 : index
    %143 = vector.load %arg9[%c32_46, %c0_47] : memref<64x128xf32, #tpu.memory_space<vmem>>, vector<8x128xf32>
    tpu.vector_store %arg9[%c32_46, %c0_47], %138 {strides = array<i32>} : memref<64x128xf32, #tpu.memory_space<vmem>>, vector<8x128xf32>,
    %144 = arith.truncf %141 : vector<8x128xf32> to vector<8x128xbf16>
    %c40 = arith.constant 40 : index
    %c0_48 = arith.constant 0 : index
    %145 = vector.load %arg7[%c40, %c0_48] : memref<64x512xf32, #tpu.memory_space<vmem>>, vector<8x512xf32>
    %cst_49 = arith.constant dense<0.000000e+00> : vector<8x512xf32>
    %146 = tpu.matmul %144, %3, %cst_49 {dimension_numbers = #tpu.dot_dimension_numbers<[1], [0], [0], [1], [0, 0, 1, 1], [], []>} : vector<8x128xbf16>, vector<128x512xbf16>, vector<8x512xf32> -> vector<8x512xf32>
    %147 = arith.addf %145, %146 : vector<8x512xf32>
    %148 = arith.truncf %147 : vector<8x512xf32> to vector<8x512xbf16>
    %149 = vector.extract_strided_slice %148 {offsets = [0, 0], sizes = [8, 384], strides = [1, 1]} : vector<8x512xbf16> to vector<8x384xbf16>
    %150 = arith.negf %149 : vector<8x384xbf16>
    %151 = math.exp %150 : vector<8x384xbf16>
    %cst_50 = arith.constant 1.000000e+00 : bf16
    %152 = vector.broadcast %cst_50 : bf16 to vector<8x384xbf16>
    %153 = arith.addf %152, %151 : vector<8x384xbf16>
    %154 = arith.divf %152, %153 : vector<8x384xbf16>
    %155 = vector.extract_strided_slice %154 {offsets = [0, 0], sizes = [8, 128], strides = [1, 1]} : vector<8x384xbf16> to vector<8x128xbf16>
    %156 = vector.extract_strided_slice %154 {offsets = [0, 128], sizes = [8, 128], strides = [1, 1]} : vector<8x384xbf16> to vector<8x128xbf16>
    %157 = vector.extract_strided_slice %154 {offsets = [0, 256], sizes = [8, 128], strides = [1, 1]} : vector<8x384xbf16> to vector<8x128xbf16>
    %158 = vector.extract_strided_slice %148 {offsets = [0, 384], sizes = [8, 128], strides = [1, 1]} : vector<8x512xbf16> to vector<8x128xbf16>
    %159 = math.tanh %158 : vector<8x128xbf16>
    %160 = arith.extf %156 : vector<8x128xbf16> to vector<8x128xf32>
    %161 = arith.mulf %160, %138 : vector<8x128xf32>
    %162 = arith.mulf %155, %159 : vector<8x128xbf16>
    %163 = arith.extf %162 : vector<8x128xbf16> to vector<8x128xf32>
    %164 = arith.addf %161, %163 : vector<8x128xf32>
    %165 = math.tanh %164 : vector<8x128xf32>
    %166 = arith.extf %157 : vector<8x128xbf16> to vector<8x128xf32>
    %167 = arith.mulf %166, %165 : vector<8x128xf32>
    %c40_51 = arith.constant 40 : index
    %c0_52 = arith.constant 0 : index
    %168 = vector.load %arg8[%c40_51, %c0_52] : memref<64x128xf32, #tpu.memory_space<vmem>>, vector<8x128xf32>
    tpu.vector_store %arg8[%c40_51, %c0_52], %167 {strides = array<i32>} : memref<64x128xf32, #tpu.memory_space<vmem>>, vector<8x128xf32>,
    %c40_53 = arith.constant 40 : index
    %c0_54 = arith.constant 0 : index
    %169 = vector.load %arg9[%c40_53, %c0_54] : memref<64x128xf32, #tpu.memory_space<vmem>>, vector<8x128xf32>
    tpu.vector_store %arg9[%c40_53, %c0_54], %164 {strides = array<i32>} : memref<64x128xf32, #tpu.memory_space<vmem>>, vector<8x128xf32>,
    %170 = arith.truncf %167 : vector<8x128xf32> to vector<8x128xbf16>
    %c48 = arith.constant 48 : index
    %c0_55 = arith.constant 0 : index
    %171 = vector.load %arg7[%c48, %c0_55] : memref<64x512xf32, #tpu.memory_space<vmem>>, vector<8x512xf32>
    %cst_56 = arith.constant dense<0.000000e+00> : vector<8x512xf32>
    %172 = tpu.matmul %170, %3, %cst_56 {dimension_numbers = #tpu.dot_dimension_numbers<[1], [0], [0], [1], [0, 0, 1, 1], [], []>} : vector<8x128xbf16>, vector<128x512xbf16>, vector<8x512xf32> -> vector<8x512xf32>
    %173 = arith.addf %171, %172 : vector<8x512xf32>
    %174 = arith.truncf %173 : vector<8x512xf32> to vector<8x512xbf16>
    %175 = vector.extract_strided_slice %174 {offsets = [0, 0], sizes = [8, 384], strides = [1, 1]} : vector<8x512xbf16> to vector<8x384xbf16>
    %176 = arith.negf %175 : vector<8x384xbf16>
    %177 = math.exp %176 : vector<8x384xbf16>
    %cst_57 = arith.constant 1.000000e+00 : bf16
    %178 = vector.broadcast %cst_57 : bf16 to vector<8x384xbf16>
    %179 = arith.addf %178, %177 : vector<8x384xbf16>
    %180 = arith.divf %178, %179 : vector<8x384xbf16>
    %181 = vector.extract_strided_slice %180 {offsets = [0, 0], sizes = [8, 128], strides = [1, 1]} : vector<8x384xbf16> to vector<8x128xbf16>
    %182 = vector.extract_strided_slice %180 {offsets = [0, 128], sizes = [8, 128], strides = [1, 1]} : vector<8x384xbf16> to vector<8x128xbf16>
    %183 = vector.extract_strided_slice %180 {offsets = [0, 256], sizes = [8, 128], strides = [1, 1]} : vector<8x384xbf16> to vector<8x128xbf16>
    %184 = vector.extract_strided_slice %174 {offsets = [0, 384], sizes = [8, 128], strides = [1, 1]} : vector<8x512xbf16> to vector<8x128xbf16>
    %185 = math.tanh %184 : vector<8x128xbf16>
    %186 = arith.extf %182 : vector<8x128xbf16> to vector<8x128xf32>
    %187 = arith.mulf %186, %164 : vector<8x128xf32>
    %188 = arith.mulf %181, %185 : vector<8x128xbf16>
    %189 = arith.extf %188 : vector<8x128xbf16> to vector<8x128xf32>
    %190 = arith.addf %187, %189 : vector<8x128xf32>
    %191 = math.tanh %190 : vector<8x128xf32>
    %192 = arith.extf %183 : vector<8x128xbf16> to vector<8x128xf32>
    %193 = arith.mulf %192, %191 : vector<8x128xf32>
    %c48_58 = arith.constant 48 : index
    %c0_59 = arith.constant 0 : index
    %194 = vector.load %arg8[%c48_58, %c0_59] : memref<64x128xf32, #tpu.memory_space<vmem>>, vector<8x128xf32>
    tpu.vector_store %arg8[%c48_58, %c0_59], %193 {strides = array<i32>} : memref<64x128xf32, #tpu.memory_space<vmem>>, vector<8x128xf32>,
    %c48_60 = arith.constant 48 : index
    %c0_61 = arith.constant 0 : index
    %195 = vector.load %arg9[%c48_60, %c0_61] : memref<64x128xf32, #tpu.memory_space<vmem>>, vector<8x128xf32>
    tpu.vector_store %arg9[%c48_60, %c0_61], %190 {strides = array<i32>} : memref<64x128xf32, #tpu.memory_space<vmem>>, vector<8x128xf32>,
    %196 = arith.truncf %193 : vector<8x128xf32> to vector<8x128xbf16>
    %c56 = arith.constant 56 : index
    %c0_62 = arith.constant 0 : index
    %197 = vector.load %arg7[%c56, %c0_62] : memref<64x512xf32, #tpu.memory_space<vmem>>, vector<8x512xf32>
    %cst_63 = arith.constant dense<0.000000e+00> : vector<8x512xf32>
    %198 = tpu.matmul %196, %3, %cst_63 {dimension_numbers = #tpu.dot_dimension_numbers<[1], [0], [0], [1], [0, 0, 1, 1], [], []>} : vector<8x128xbf16>, vector<128x512xbf16>, vector<8x512xf32> -> vector<8x512xf32>
    %199 = arith.addf %197, %198 : vector<8x512xf32>
    %200 = arith.truncf %199 : vector<8x512xf32> to vector<8x512xbf16>
    %201 = vector.extract_strided_slice %200 {offsets = [0, 0], sizes = [8, 384], strides = [1, 1]} : vector<8x512xbf16> to vector<8x384xbf16>
    %202 = arith.negf %201 : vector<8x384xbf16>
    %203 = math.exp %202 : vector<8x384xbf16>
    %cst_64 = arith.constant 1.000000e+00 : bf16
    %204 = vector.broadcast %cst_64 : bf16 to vector<8x384xbf16>
    %205 = arith.addf %204, %203 : vector<8x384xbf16>
    %206 = arith.divf %204, %205 : vector<8x384xbf16>
    %207 = vector.extract_strided_slice %206 {offsets = [0, 0], sizes = [8, 128], strides = [1, 1]} : vector<8x384xbf16> to vector<8x128xbf16>
    %208 = vector.extract_strided_slice %206 {offsets = [0, 128], sizes = [8, 128], strides = [1, 1]} : vector<8x384xbf16> to vector<8x128xbf16>
    %209 = vector.extract_strided_slice %206 {offsets = [0, 256], sizes = [8, 128], strides = [1, 1]} : vector<8x384xbf16> to vector<8x128xbf16>
    %210 = vector.extract_strided_slice %200 {offsets = [0, 384], sizes = [8, 128], strides = [1, 1]} : vector<8x512xbf16> to vector<8x128xbf16>
    %211 = math.tanh %210 : vector<8x128xbf16>
    %212 = arith.extf %208 : vector<8x128xbf16> to vector<8x128xf32>
    %213 = arith.mulf %212, %190 : vector<8x128xf32>
    %214 = arith.mulf %207, %211 : vector<8x128xbf16>
    %215 = arith.extf %214 : vector<8x128xbf16> to vector<8x128xf32>
    %216 = arith.addf %213, %215 : vector<8x128xf32>
    %217 = math.tanh %216 : vector<8x128xf32>
    %218 = arith.extf %209 : vector<8x128xbf16> to vector<8x128xf32>
    %219 = arith.mulf %218, %217 : vector<8x128xf32>
    %c56_65 = arith.constant 56 : index
    %c0_66 = arith.constant 0 : index
    %220 = vector.load %arg8[%c56_65, %c0_66] : memref<64x128xf32, #tpu.memory_space<vmem>>, vector<8x128xf32>
    tpu.vector_store %arg8[%c56_65, %c0_66], %219 {strides = array<i32>} : memref<64x128xf32, #tpu.memory_space<vmem>>, vector<8x128xf32>,
    %c56_67 = arith.constant 56 : index
    %c0_68 = arith.constant 0 : index
    %221 = vector.load %arg9[%c56_67, %c0_68] : memref<64x128xf32, #tpu.memory_space<vmem>>, vector<8x128xf32>
    tpu.vector_store %arg9[%c56_67, %c0_68], %216 {strides = array<i32>} : memref<64x128xf32, #tpu.memory_space<vmem>>, vector<8x128xf32>,
    %c0_69 = arith.constant 0 : index
    %c0_70 = arith.constant 0 : index
    %222 = vector.load %arg8[%c0_69, %c0_70] : memref<64x128xf32, #tpu.memory_space<vmem>>, vector<64x128xf32>
    %223 = arith.truncf %222 : vector<64x128xf32> to vector<64x128xbf16>
    %c0_71 = arith.constant 0 : index
    %c0_72 = arith.constant 0 : index
    %c0_73 = arith.constant 0 : index
    %224 = vector.load %arg5[%c0_71, %c0_72, %c0_73] : memref<1x64x128xbf16, #tpu.memory_space<vmem>>, vector<1x64x128xbf16>
    %225 = vector.shape_cast %224 : vector<1x64x128xbf16> to vector<64x128xbf16>
    %226 = vector.shape_cast %223 : vector<64x128xbf16> to vector<1x64x128xbf16>
    tpu.vector_store %arg5[%c0_71, %c0_72, %c0_73], %226 {strides = array<i32>} : memref<1x64x128xbf16, #tpu.memory_space<vmem>>, vector<1x64x128xbf16>,
    %c0_74 = arith.constant 0 : index
    %c0_75 = arith.constant 0 : index
    %227 = vector.load %arg9[%c0_74, %c0_75] : memref<64x128xf32, #tpu.memory_space<vmem>>, vector<64x128xf32>
    %228 = arith.truncf %227 : vector<64x128xf32> to vector<64x128xbf16>
    %c0_76 = arith.constant 0 : index
    %c0_77 = arith.constant 0 : index
    %c0_78 = arith.constant 0 : index
    %229 = vector.load %arg6[%c0_76, %c0_77, %c0_78] : memref<1x64x128xbf16, #tpu.memory_space<vmem>>, vector<1x64x128xbf16>
    %230 = vector.shape_cast %229 : vector<1x64x128xbf16> to vector<64x128xbf16>
    %231 = vector.shape_cast %228 : vector<64x128xbf16> to vector<1x64x128xbf16>
    tpu.vector_store %arg6[%c0_76, %c0_77, %c0_78], %231 {strides = array<i32>} : memref<1x64x128xbf16, #tpu.memory_space<vmem>>, vector<1x64x128xbf16>,
    return
  }
  func.func @transform_0(%arg0: i32) -> (i32, i32) {
    %c0_i32 = arith.constant 0 : i32
    %c0_i32_0 = arith.constant 0 : i32
    %c0_i32_1 = arith.constant 0 : i32
    return %c0_i32, %c0_i32_0 : i32, i32
  }
  func.func @transform_1(%arg0: i32) -> (i32, i32, i32) {
    %c0_i32 = arith.constant 0 : i32
    %c0_i32_0 = arith.constant 0 : i32
    %c0_i32_1 = arith.constant 0 : i32
    return %arg0, %c0_i32, %c0_i32_0 : i32, i32, i32
  }
  func.func @transform_2(%arg0: i32) -> (i32, i32, i32) {
    %c0_i32 = arith.constant 0 : i32
    %c0_i32_0 = arith.constant 0 : i32
    %c0_i32_1 = arith.constant 0 : i32
    return %arg0, %c0_i32, %c0_i32_0 : i32, i32, i32
  }
  func.func @transform_3(%arg0: i32) -> (i32, i32, i32) {
    %c0_i32 = arith.constant 0 : i32
    %c0_i32_0 = arith.constant 0 : i32
    %c0_i32_1 = arith.constant 0 : i32
    return %arg0, %c0_i32, %c0_i32_0 : i32, i32, i32
  }
  func.func @transform_4(%arg0: i32) -> (i32, i32, i32) {
    %c0_i32 = arith.constant 0 : i32
    %c0_i32_0 = arith.constant 0 : i32
    %c0_i32_1 = arith.constant 0 : i32
    return %arg0, %c0_i32, %c0_i32_0 : i32, i32, i32
  }
  func.func @transform_5(%arg0: i32) -> (i32, i32, i32) {
    %c0_i32 = arith.constant 0 : i32
    %c0_i32_0 = arith.constant 0 : i32
    %c0_i32_1 = arith.constant 0 : i32
    return %arg0, %c0_i32, %c0_i32_0 : i32, i32, i32
  }
}

</mosaic_0001>

<bundles_post_ra>
// kernel: stacked_lstm_forward.1
= control target key start
LH: loop header
LB: loop body
LE: loop exit
PB: predicated region body
PF: predicated region fallthrough
CT: control target
= control target key end

     0   :  { %11 = vsyncpa [#allocation6], 0  ;;  %s4315_s0 = inlined_call_operand.hbm [shape: bf16[64,128], index: 0, kind: input, shape index: {}]   ;;  %s4316_s1 = inlined_call_operand.hbm [shape: bf16[2,128,512], index: 1, kind: input, shape index: {}]   ;;  %s4317_s2 = inlined_call_operand.hbm [shape: bf16[2,128,512], index: 2, kind: input, shape index: {}]   ;;  %s4318_s3 = inlined_call_operand.vmem [shape: bf16[2,1,512], index: 3, kind: input, shape index: {}]   ;;  %s4319_s4 = inlined_call_operand.vmem [shape: bf16[2,64,128], index: 4, kind: output, shape index: {0}]   ;;  %s4320_s5 = inlined_call_operand.vmem [shape: bf16[2,64,128], index: 5, kind: output, shape index: {1}]  }
   0x1   :  { %12 = vsyncpa [#allocation8], 0 }
   0x2   :  { %14 = vsyncpa [#allocation8 + $0x1], 0  ;;  %s3203_s18 = smov 0   ;;  %s3205_s19 = smov 0  }
   0x3   :  { %s3207_s20 = smov 0   ;;  %s3209_s21 = smov 0  }
   0x4 LB: > { %s3224_s22 = sadd.s32 1, %s3161_s21   ;;  %s48_s23 = sadd.s32 1, %s3157_s20  ;;  %s3161_s21 = sphi %s3209_s21, %s4398_s21   ;;  %s3157_s20 = sphi %s3207_s20, %s4397_s20   ;;  %s3153_s19 = sphi %s3205_s19, %s4396_s19   ;;  %s3149_s18 = sphi %s3203_s18, %s4395_s18  }
   0x5   : > { %s45_s24 = ssub.s32 %s3161_s21, %s3224_s22  ;;  %p55_p0 = scmp.ne.s32.totalorder %s3157_s20, %s3153_s19 }
   0x6   : > { %p46_p1 = scmp.eq.s32.totalorder %s45_s24, 0  ;;  %p56_p2 = scmp.eq.s32.totalorder %s3161_s21, 0 }
   0x7   : > { %p2861_p3 = scmp.lt.s32.totalorder %s3161_s21, 2  ;;  %s202_s26 = sand.u32 1, %s3161_s21  }
   0x8   : > { %s3234_s25 = scalar_select %p46_p1, %s3157_s20, %s48_s23  }
   0x9   : > { %p57_p4 = por %p56_p2, %p55_p0  ;;  %s204_s27 = sand.u32 1, %s3157_s20  }
   0xa   : > { %s3238_s28 = sshll.u32 %s204_s27, 8  ;;  %s2775_s29 = sshll.u32 %s3161_s21, 12 }
   0xb   : > { %s3246_s7 = scalar_lea.hbm %s4316_s1, %s2775_s29  ;;  %s206_s8 = scalar_lea.vmem [#allocation7], %s3238_s28 }
   0xc   : > { %s213_s9 = sshll.u32 %s206_s8, 4  ;;  %p3249_p5 = pnand %p2861_p3, %p57_p4  ;;  %s3253_s9 = int_to_ptr.vmem [resolvable:$true] %s213_s9 }
   0xd   : > { %s3255_s11 = scalar_lea.sflag [#allocation8], %s202_s26  ;;  %s3035_s12 = scalar_lea.hbm %s3246_s7, 4096 }
   0xe   : > { %p3036_p6 = scmp.ne.s32.totalorder %s3246_s7, %s3035_s12  ;;  %p3037_p7 = pneg %p3249_p5 }
   0xf   : > { %s3040_s15 = scalar_lea.hbm %s4316_s1, 8192  ;;  %p3041_p10 = scmp.lt.u32.totalorder %s3246_s7, %s4316_s1 }
  0x10   : > { %p3038_p8 = pnand %p3037_p7, %p3036_p6  ;;  %p3042_p11 = scmp.lt.u32.totalorder %s3040_s15, %s3035_s12 }
  0x11   : > { %p3044_p13 = scmp.lt.u32.totalorder %s3035_s12, %s3246_s7 }
  0x12   : > { %p3039_p9 = pneg %p3038_p8  ;;  %p3043_p12 = por %p3042_p11, %p3041_p10 }
  0x14   : > { %p3045_p0 = por %p3044_p13, %p3043_p12 }
  0x16   : > { %p3046_p1 = pnand %p3045_p0, %p3039_p9 }
  0x18   : > { %3049 = shalt.err (!%p3046_p1)
}
  0x19   : > { %s3050_s23 = scalar_lea.vmem %s3253_s9, 4096  ;;  %s3163_s24 = smov [#allocation7]  }
  0x1a   : > { %p3051_p2 = scmp.ne.s32.totalorder %s3253_s9, %s3050_s23  ;;  %s3055_s26 = sshll.u32 %s3163_s24, 4  ;;  %s3056_s26 = int_to_ptr.vmem [resolvable:$false] %s3055_s26 }
  0x1b   : > { %s3057_s27 = scalar_lea.vmem %s3056_s26, 8192  ;;  %p3058_p6 = scmp.lt.s32.totalorder %s3253_s9, %s3056_s26 }
  0x1c   : > { %p3053_p3 = pnand %p3051_p2, %p3037_p7  ;;  %p3059_p8 = scmp.lt.s32.totalorder %s3057_s27, %s3050_s23 }
  0x1e   : > { %p3054_p4 = pneg %p3053_p3  ;;  %p3060_p10 = por %p3059_p8, %p3058_p6 }
  0x20   : > { %p3061_p11 = pnand %p3060_p10, %p3054_p4 }
  0x22   : > { %3064 = shalt.err (!%p3061_p11)
}
  0x23   : > { %s3164_s30 = smov 256   ;;  %s3165_s6 = smov 16  }
  0x24   : > { %2856 = dma.hbm_to_vmem [thread:$0]  (!%p3249_p5), %s3246_s7, 4096, %s3253_s9, %s3255_s11, %s3164_s30, %s3164_s30, %s3165_s6  }
  0x25   : > { %s3291_s13 = scalar_lea.hbm %s4317_s2, %s2775_s29  ;;  %s227_s14 = scalar_lea.vmem [#allocation9], %s3238_s28 }
  0x26   : > { %s234_s15 = sshll.u32 %s227_s14, 4  ;;  %s3297_s16 = sadd.s32 4294967295, %s3161_s21   ;;  %s3294_s15 = int_to_ptr.vmem [resolvable:$true] %s234_s15 }
  0x27   : > { %p61_p9 = scmp.ne.s32.totalorder %s3153_s19, %s3149_s18  ;;  %p4321_p12 = scmp.eq.s32.totalorder %s3297_s16, 0 }
  0x28   : > { %p2613_p13 = scmp.ge.s32.totalorder %s3161_s21, 1  ;;  %p176_p0 = scmp.lt.s32.totalorder %s3161_s21, 3 }
  0x29   : > { %p3307_p2 = por %p4321_p12, %p61_p9  ;;  %s3166_s7 = smov [#allocation5]  }
  0x2a   : > { %p3311_p3 = pnand %p2613_p13, %p176_p0  ;;  %s188_s9 = sshll.u32 %s3166_s7, 4  ;;  %s3315_s9 = int_to_ptr.vmem [resolvable:$true] %s188_s9 }
  0x2b   : > { %s4345_s28 = scalar_select %p3307_p2, 1, 0 }
  0x2c   : > { %s4346_s29 = scalar_select %p3311_p3, 1, 0 }
  0x2d   : > { %s3065_s18 = scalar_lea.hbm %s3291_s13, 4096  ;;  %s3070_s23 = scalar_lea.hbm %s4317_s2, 8192 }
  0x2e   : > { %p3066_p6 = scmp.ne.s32.totalorder %s3291_s13, %s3065_s18  ;;  %p3071_p11 = scmp.lt.u32.totalorder %s3291_s13, %s4317_s2 }
  0x2f   : > { %p3072_p9 = scmp.lt.u32.totalorder %s3070_s23, %s3065_s18  ;;  %p3074_p0 = scmp.lt.u32.totalorder %s3065_s18, %s3291_s13 }
  0x30   : > { %p3068_p8 = pnand %p3066_p6, %p3037_p7 }
  0x31   : > { %p3073_p13 = por %p3072_p9, %p3071_p11 }
  0x32   : > { %p3069_p10 = pneg %p3068_p8 }
  0x33   : > { %p3075_p1 = por %p3074_p0, %p3073_p13 }
  0x35   : > { %p3076_p12 = pnand %p3075_p1, %p3069_p10 }
  0x37   : > { %3079 = shalt.err (!%p3076_p12)
}
  0x38   : > { %s3080_s27 = scalar_lea.vmem %s3294_s15, 4096  ;;  %s3167_s8 = smov [#allocation9]  }
  0x39   : > { %p3081_p6 = scmp.ne.s32.totalorder %s3294_s15, %s3080_s27  ;;  %s3085_s12 = sshll.u32 %s3167_s8, 4  ;;  %s3086_s12 = int_to_ptr.vmem [resolvable:$false] %s3085_s12 }
  0x3a   : > { %s3087_s14 = scalar_lea.vmem %s3086_s12, 8192  ;;  %p3088_p2 = scmp.lt.s32.totalorder %s3294_s15, %s3086_s12 }
  0x3b   : > { %p3083_p8 = pnand %p3081_p6, %p3037_p7  ;;  %p3089_p11 = scmp.lt.s32.totalorder %s3087_s14, %s3080_s27 }
  0x3d   : > { %p3084_p4 = pneg %p3083_p8  ;;  %p3090_p9 = por %p3089_p11, %p3088_p2 }
  0x3f   : > { %p3091_p13 = pnand %p3090_p9, %p3084_p4 }
  0x41   : > { %3094 = shalt.err (!%p3091_p13)
}
  0x42   : > { %2859 = dma.hbm_to_vmem [thread:$0]  (!%p3249_p5), %s3291_s13, 4096, %s3294_s15, %s3255_s11, %s3164_s30, %s3164_s30, %s3165_s6  }
  0x43   : > { %p4347_p7 = scmp.eq.s32.totalorder %s3297_s16, 0  ;;  %p4348_p12 = pneg %p3311_p3 }
  0x44   : > { %s3095_s10 = scalar_lea.hbm %s4315_s0, 512 }
  0x45   : > { %p3351_p1 = pnand %p4348_p12, %p4347_p7  ;;  %p3096_p2 = scmp.ne.s32.totalorder %s4315_s0, %s3095_s10 }
  0x46   : > { %p3102_p0 = scmp.lt.u32.totalorder %s3095_s10, %s4315_s0 }
  0x47   : > { %p3097_p4 = pneg %p3351_p1 }
  0x49   : > { %p3098_p10 = pnand %p3097_p4, %p3096_p2 }
  0x4b   : > { %p3099_p5 = pneg %p3098_p10 }
  0x4d   : > { %p3104_p6 = pnand %p3102_p0, %p3099_p5 }
  0x4f   : > { %3107 = shalt.err (!%p3104_p6)
}
  0x50   : > { %s3108_s6 = scalar_lea.vmem %s3315_s9, 512  ;;  %p3116_p13 = scmp.lt.s32.totalorder %s3315_s9, %s3315_s9 }
  0x51   : > { %p3109_p8 = scmp.ne.s32.totalorder %s3315_s9, %s3108_s6  ;;  %p3117_p7 = scmp.lt.s32.totalorder %s3108_s6, %s3108_s6 }
  0x53   : > { %p3111_p11 = pnand %p3109_p8, %p3097_p4  ;;  %p3118_p12 = por %p3117_p7, %p3116_p13 }
  0x55   : > { %p3112_p9 = pneg %p3111_p11 }
  0x57   : > { %p3119_p3 = pnand %p3118_p12, %p3112_p9 }
  0x59   : > { %3122 = shalt.err (!%p3119_p3)
}
  0x5a   : > { %s3168_s13 = smov 64   ;;  %s3169_s15 = smov 4  }
  0x5b   : > { %2852 = dma.hbm_to_vmem [thread:$0]  (!%p3351_p1), %s4315_s0, 512, %s3315_s9, [#allocation6], %s3168_s13, %s3168_s13, %s3169_s15  }
  0x5c   : > { %p4350_p2 = scmp.ne.s32.totalorder %s4346_s29, 0 }
  0x5e   : > { %253 = sbr.rel (%p4350_p2) target bundleno = 2871 (0xb37), region = 36 }
  0x65   : > { %p4351_p4 = scmp.eq.s32.totalorder %s3297_s16, 0 }
  0x67   : > { %3140 = dma.done.wait (%p4351_p4), [#allocation6], 512   ;;  %p4352_p10 = pmov %p4351_p4 }
  0x68   : > { %s259_s27 = sand.u32 1, %s3297_s16   ;;  %s261_s8 = sand.u32 1, %s3153_s19  }
  0x69   : > { %3142 = vsyncadd (%p4352_p10), [#allocation6], 4294966784  ;;  %s3384_s12 = sshll.u32 %s261_s8, 8  ;;  %s260_s14 = scalar_lea.sflag [#allocation8], %s259_s27 }
  0x6a   : > { %s3387_s7 = scalar_lea.vmem [#allocation7], %s3384_s12  ;;  %p4353_p3 = scmp.ne.s32.totalorder %s4345_s28, 0 }
  0x6c   : > { %3144 = dma.done.wait (%p4353_p3), %s260_s14, 8192  }
  0x6d   : > { %3146 = vsyncadd (%p4353_p3), %s260_s14, 4294959104  ;;  %p313_p1 = scmp.lt.s32.totalorder %s3297_s16, 1  ;;  %v3409_v0 = vld [vmem:[%s3387_s7] sm:$0xff]  ;;  %v3412_v1 = vld [vmem:[%s3387_s7 + $0x8] sm:$0xff]  ;;  %s3505_s11 = scalar_lea.vmem [#allocation9], %s3384_s12 }
  0x6e   : > { %v3415_v2 = vld [vmem:[%s3387_s7 + $0x10] sm:$0xff]  ;;  %v3418_v3 = vld [vmem:[%s3387_s7 + $0x18] sm:$0xff]  ;;  %v3421_v4 = vld [vmem:[%s3387_s7 + $0x20] sm:$0xff]  ;;  %p4374_p5 = scmp.ne.s32.totalorder %s3297_s16, 0 }
  0x6f   : > { %s3395_s29 = scalar_select %p313_p1, %s3297_s16, 1  ;;  %v3424_v5 = vld [vmem:[%s3387_s7 + $0x28] sm:$0xff]  ;;  %v3427_v6 = vld [vmem:[%s3387_s7 + $0x30] sm:$0xff]  ;;  %v3430_v7 = vld [vmem:[%s3387_s7 + $0x38] sm:$0xff] }
  0x70   : > { %v3433_v8 = vld [vmem:[%s3387_s7 + $0x40] sm:$0xff]  ;;  %v3436_v9 = vld [vmem:[%s3387_s7 + $0x48] sm:$0xff]  ;;  %v3439_v10 = vld [vmem:[%s3387_s7 + $0x50] sm:$0xff] }
  0x71   : > { %s2777_s28 = sshll.u32 %s3395_s29, 5  ;;  %v3442_v11 = vld [vmem:[%s3387_s7 + $0x58] sm:$0xff]  ;;  %v3445_v12 = vld [vmem:[%s3387_s7 + $0x60] sm:$0xff]  ;;  %v3448_v13 = vld [vmem:[%s3387_s7 + $0x68] sm:$0xff]  ;;  %s2626_s30 = sshll.u32 %s3395_s29, 2 }
  0x72   : > { %s3401_s21 = scalar_lea.vmem %s4319_s4, %s2777_s28  ;;  %s3406_s23 = scalar_lea.vmem %s4320_s5, %s2777_s28  ;;  %v3451_v14 = vld [vmem:[%s3387_s7 + $0x70] sm:$0xff]  ;;  %v3454_v15 = vld [vmem:[%s3387_s7 + $0x78] sm:$0xff]  ;;  %v3457_v16 = vld [vmem:[%s3387_s7 + $0x80] sm:$0xff] }
  0x73   : > { %v3460_v17 = vld [vmem:[%s3387_s7 + $0x88] sm:$0xff]  ;;  %v3463_v18 = vld [vmem:[%s3387_s7 + $0x90] sm:$0xff]  ;;  %v3466_v19 = vld [vmem:[%s3387_s7 + $0x98] sm:$0xff]  ;;  %s316_s15 = scalar_lea.vmem %s4318_s3, %s2626_s30 }
  0x74   : > { %v3469_v20 = vld [vmem:[%s3387_s7 + $0xa0] sm:$0xff]  ;;  %v3472_v21 = vld [vmem:[%s3387_s7 + $0xa8] sm:$0xff]  ;;  %v3475_v22 = vld [vmem:[%s3387_s7 + $0xb0] sm:$0xff] }
  0x75   : > { %v3478_v23 = vld [vmem:[%s3387_s7 + $0xb8] sm:$0xff]  ;;  %v3481_v24 = vld [vmem:[%s3387_s7 + $0xc0] sm:$0xff]  ;;  %v3484_v25 = vld [vmem:[%s3387_s7 + $0xc8] sm:$0xff] }
  0x76   : > { %v3487_v26 = vld [vmem:[%s3387_s7 + $0xd0] sm:$0xff]  ;;  %v3490_v27 = vld [vmem:[%s3387_s7 + $0xd8] sm:$0xff]  ;;  %v3493_v28 = vld [vmem:[%s3387_s7 + $0xe0] sm:$0xff] }
  0x77   : > { %v3496_v29 = vld [vmem:[%s3387_s7 + $0xe8] sm:$0xff]  ;;  %v3499_v30 = vld [vmem:[%s3387_s7 + $0xf0] sm:$0xff]  ;;  %v3502_v31 = vld [vmem:[%s3387_s7 + $0xf8] sm:$0xff] }
  0x78   : > { %v3508_v32 = vld [vmem:[%s3505_s11] sm:$0xff]  ;;  %v3511_v33 = vld [vmem:[%s3505_s11 + $0x8] sm:$0xff]  ;;  %v3514_v34 = vld [vmem:[%s3505_s11 + $0x10] sm:$0xff] }
  0x79   : > { %v3517_v35 = vld [vmem:[%s3505_s11 + $0x18] sm:$0xff]  ;;  %v3520_v36 = vld [vmem:[%s3505_s11 + $0x20] sm:$0xff]  ;;  %v3523_v37 = vld [vmem:[%s3505_s11 + $0x28] sm:$0xff] }
  0x7a   : > { %v3526_v38 = vld [vmem:[%s3505_s11 + $0x30] sm:$0xff]  ;;  %v3529_v39 = vld [vmem:[%s3505_s11 + $0x38] sm:$0xff]  ;;  %v3532_v40 = vld [vmem:[%s3505_s11 + $0x40] sm:$0xff] }
  0x7b   : > { %v3535_v41 = vld [vmem:[%s3505_s11 + $0x48] sm:$0xff]  ;;  %v3538_v42 = vld [vmem:[%s3505_s11 + $0x50] sm:$0xff]  ;;  %v3541_v43 = vld [vmem:[%s3505_s11 + $0x58] sm:$0xff] }
  0x7c   : > { %v3544_v44 = vld [vmem:[%s3505_s11 + $0x60] sm:$0xff]  ;;  %v3548_v45 = vld [vmem:[%s3505_s11 + $0x68] sm:$0xff]  ;;  %v3551_v46 = vld [vmem:[%s3505_s11 + $0x70] sm:$0xff] }
  0x7d   : > { %4354 = vst [vmem:[#allocation12_spill] sm:$0xff] %v3544_v44  ;;  %4355 = vst [vmem:[#allocation13_spill] sm:$0xff] %v3548_v45  ;;  %v3554_v47 = vld [vmem:[%s3505_s11 + $0x78] sm:$0xff]  ;;  %v3557_v48 = vld [vmem:[%s3505_s11 + $0x80] sm:$0xff] }
  0x7e   : > { %4356 = vst [vmem:[#allocation14_spill] sm:$0xff] %v3551_v46  ;;  %4357 = vst [vmem:[#allocation15_spill] sm:$0xff] %v3554_v47  ;;  %v3560_v49 = vld [vmem:[%s3505_s11 + $0x88] sm:$0xff]  ;;  %v3563_v50 = vld [vmem:[%s3505_s11 + $0x90] sm:$0xff] }
  0x7f   : > { %4358 = vst [vmem:[#allocation16_spill] sm:$0xff] %v3557_v48  ;;  %4359 = vst [vmem:[#allocation17_spill] sm:$0xff] %v3560_v49  ;;  %v3566_v51 = vld [vmem:[%s3505_s11 + $0x98] sm:$0xff]  ;;  %v3569_v52 = vld [vmem:[%s3505_s11 + $0xa0] sm:$0xff] }
  0x80   : > { %4360 = vst [vmem:[#allocation18_spill] sm:$0xff] %v3563_v50  ;;  %4361 = vst [vmem:[#allocation19_spill] sm:$0xff] %v3566_v51  ;;  %v3572_v53 = vld [vmem:[%s3505_s11 + $0xa8] sm:$0xff]  ;;  %v3578_v54 = vld [vmem:[%s3505_s11 + $0xb0] sm:$0xff]  ;;  %398 = sbr.rel (%p4374_p5) target bundleno = 408 (0x198), region = 52 }
  0x81   : > { %4362 = vst [vmem:[#allocation20_spill] sm:$0xff] %v3569_v52  ;;  %4363 = vst [vmem:[#allocation21_spill] sm:$0xff] %v3572_v53  ;;  %v3581_v55 = vld [vmem:[%s3505_s11 + $0xb8] sm:$0xff]  ;;  %v3584_v56 = vld [vmem:[%s3505_s11 + $0xc0] sm:$0xff] }
  0x82   : > { %4364 = vst [vmem:[#allocation22_spill] sm:$0xff] %v3578_v54  ;;  %4365 = vst [vmem:[#allocation23_spill] sm:$0xff] %v3581_v55  ;;  %v3587_v57 = vld [vmem:[%s3505_s11 + $0xc8] sm:$0xff]  ;;  %v3590_v58 = vld [vmem:[%s3505_s11 + $0xd0] sm:$0xff]  ;;  %v2647_v55 = vcombine.high (!%p4374_p5), %v3436_v9, %v3442_v11  ;;  %v3170_v54 = vmov (!%p4374_p5), 0  }
  0x83   : > { %4366 = vst [vmem:[#allocation24_spill] sm:$0xff] %v3584_v56  ;;  %4367 = vst [vmem:[#allocation25_spill] sm:$0xff] %v3587_v57  ;;  %v3593_v59 = vld [vmem:[%s3505_s11 + $0xd8] sm:$0xff]  ;;  %v3596_v60 = vld [vmem:[%s3505_s11 + $0xe0] sm:$0xff]  ;;  %v2637_v57 = vcombine.high (!%p4374_p5), %v3409_v0, %v3415_v2  ;;  %v2642_v56 = vcombine.low (!%p4374_p5), %v3424_v5, %v3430_v7  ;;  %660 = vmatprep.mubr.bf16.mxu0 (!%p4374_p5), %v3170_v54  ;;  %733 = vmatprep.mubr.bf16.mxu1 (!%p4374_p5), %v3170_v54 }
  0x84   : > { %4368 = vst [vmem:[#allocation26_spill] sm:$0xff] %v3590_v58  ;;  %4369 = vst [vmem:[#allocation27_spill] sm:$0xff] %v3593_v59  ;;  %v3599_v61 = vld [vmem:[%s3505_s11 + $0xe8] sm:$0xff]  ;;  %v3602_v62 = vld [vmem:[%s3505_s11 + $0xf0] sm:$0xff]  ;;  %v2639_v59 = vcombine.high (!%p4374_p5), %v3412_v1, %v3418_v3  ;;  %v2645_v58 = vcombine.high (!%p4374_p5), %v3433_v8, %v3439_v10 }
  0x85   : > { %4370 = vst [vmem:[#allocation28_spill] sm:$0xff] %v3596_v60  ;;  %4371 = vst [vmem:[#allocation29_spill] sm:$0xff] %v3599_v61  ;;  %v3605_v63 = vld [vmem:[%s3505_s11 + $0xf8] sm:$0xff]  ;;  %v393_v53 = vld [vmem:[%s316_s15] sm:$0xf]  ;;  %v2636_v60 = vcombine.low (!%p4374_p5), %v3409_v0, %v3415_v2  ;;  %v2638_v61 = vcombine.low (!%p4374_p5), %v3412_v1, %v3418_v3  ;;  %628 = vmatprep.subr.bf16.mxu0 (!%p4374_p5), %v2637_v57  ;;  %v2644_v57 = vcombine.low (!%p4374_p5), %v3433_v8, %v3439_v10 }
  0x86   : > { %4372 = vst [vmem:[#allocation30_spill] sm:$0xff] %v3602_v62  ;;  %4373 = vst [vmem:[#allocation31_spill] sm:$0xff] %v3605_v63  ;;  %v3607_v52 = vunpack.c.l.bf16 %v393_v53  ;;  %v2641_v63 = vcombine.high (!%p4374_p5), %v3421_v4, %v3427_v6  ;;  %v2643_v53 = vcombine.high (!%p4374_p5), %v3424_v5, %v3430_v7  ;;  %701 = vmatprep.subr.bf16.mxu1 (!%p4374_p5), %v2639_v59 }
  0x87   : > { %629 = vmatpush1.bf16.msra.mxu0 %v2636_v60  ;;  %702 = vmatpush1.bf16.msra.mxu1 %v2638_v61  ;;  %v2640_v62 = vcombine.low %v3421_v4, %v3427_v6  ;;  %v2646_v59 = vcombine.low %v3436_v9, %v3442_v11  ;;  %v2649_v60 = vcombine.high %v3445_v12, %v3451_v14 }
  0x88   : > { %630 = vmatprep.subr.bf16.mxu0 %v2641_v63  ;;  %703 = vmatprep.subr.bf16.mxu1 %v2643_v53  ;;  %v2651_v61 = vcombine.high %v3448_v13, %v3454_v15  ;;  %v2652_v63 = vcombine.low %v3457_v16, %v3463_v18  ;;  %v2654_v53 = vcombine.low %v3460_v17, %v3466_v19 }
  0x8b   : > { %631 = vmatpush1.bf16.msra.mxu0 %v2640_v62  ;;  %704 = vmatpush1.bf16.msra.mxu1 %v2642_v56  ;;  %v2648_v62 = vcombine.low %v3445_v12, %v3451_v14  ;;  %v2650_v56 = vcombine.low %v3448_v13, %v3454_v15 }
  0x8c   : > { %632 = vmatprep.subr.bf16.mxu0 %v2645_v58  ;;  %705 = vmatprep.subr.bf16.mxu1 %v2647_v55  ;;  %v2653_v58 = vcombine.high %v3457_v16, %v3463_v18  ;;  %v2655_v55 = vcombine.high %v3460_v17, %v3466_v19 }
  0x8f   : > { %633 = vmatpush1.bf16.msra.mxu0 %v2644_v57  ;;  %706 = vmatpush1.bf16.msra.mxu1 %v2646_v59  ;;  %v2657_v57 = vcombine.high %v3469_v20, %v3475_v22  ;;  %v2659_v59 = vcombine.high %v3472_v21, %v3478_v23 }
  0x90   : > { %634 = vmatprep.subr.bf16.mxu0 %v2649_v60  ;;  %707 = vmatprep.subr.bf16.mxu1 %v2651_v61  ;;  %v2656_v60 = vcombine.low %v3469_v20, %v3475_v22  ;;  %v2658_v61 = vcombine.low %v3472_v21, %v3478_v23 }
  0x93   : > { %635 = vmatpush1.bf16.msra.mxu0 %v2648_v62  ;;  %708 = vmatpush1.bf16.msra.mxu1 %v2650_v56  ;;  %v2661_v62 = vcombine.high %v3481_v24, %v3487_v26  ;;  %v2663_v56 = vcombine.high %v3484_v25, %v3490_v27 }
  0x94   : > { %636 = vmatprep.subr.bf16.mxu0 %v2653_v58  ;;  %709 = vmatprep.subr.bf16.mxu1 %v2655_v55  ;;  %v2660_v58 = vcombine.low %v3481_v24, %v3487_v26  ;;  %v2662_v55 = vcombine.low %v3484_v25, %v3490_v27 }
  0x97   : > { %637 = vmatpush1.bf16.msra.mxu0 %v2652_v63  ;;  %710 = vmatpush1.bf16.msra.mxu1 %v2654_v53  ;;  %v2665_v63 = vcombine.high %v3493_v28, %v3499_v30  ;;  %v2667_v53 = vcombine.high %v3496_v29, %v3502_v31 }
  0x98   : > { %638 = vmatprep.subr.bf16.mxu0 %v2657_v57  ;;  %711 = vmatprep.subr.bf16.mxu1 %v2659_v59  ;;  %v2664_v57 = vcombine.low %v3493_v28, %v3499_v30  ;;  %v2666_v59 = vcombine.low %v3496_v29, %v3502_v31 }
  0x9b   : > { %639 = vmatpush1.bf16.msra.mxu0 %v2656_v60  ;;  %712 = vmatpush1.bf16.msra.mxu1 %v2658_v61  ;;  %v2903_v60 = vld [vmem:[#allocation5] sm:$0xff]   ;;  %v2904_v61 = vld [vmem:[#allocation5 + $0x8] sm:$0xff]  }
  0x9c   : > { %640 = vmatprep.subr.bf16.mxu0 %v2661_v62  ;;  %713 = vmatprep.subr.bf16.mxu1 %v2663_v56  ;;  %v2905_v62 = vld [vmem:[#allocation5 + $0x10] sm:$0xff]   ;;  %v2906_v56 = vld [vmem:[#allocation5 + $0x18] sm:$0xff]  }
  0x9f   : > { %641 = vmatpush1.bf16.msra.mxu0 %v2660_v58  ;;  %714 = vmatpush1.bf16.msra.mxu1 %v2662_v55  ;;  %v408_v58 = vlaneseq }
  0xa0   : > { %642 = vmatprep.subr.bf16.mxu0 %v2665_v63  ;;  %715 = vmatprep.subr.bf16.mxu1 %v2667_v53 }
  0xa1   : > { %v409_v55 = vshrl.u32 %v408_v58, 7 }
  0xa3   : > { %643 = vmatpush1.bf16.msra.mxu0 %v2664_v57  ;;  %716 = vmatpush1.bf16.msra.mxu1 %v2666_v59  ;;  %v410_v63 = vsub.s32 0, %v409_v55  ;;  %v418_v53 = vsub.s32 4, %v409_v55  ;;  %v414_v57 = vsub.s32 2, %v409_v55  ;;  %v422_v59 = vsub.s32 6, %v409_v55 }
  0xa5   : > { %v415_v49 = vrot.slane %v3607_v52, %v414_v57 }
  0xa6   : > { %661 = vmatmul.mubr.bf16.vlgmr.msra.gmra.mrb[0].mxu0 %v2903_v60  ;;  %734 = vmatmul.mubr.bf16.vlgmr.msra.gmra.mrb[0].mxu1 %v2903_v60  ;;  %v411_v60 = vrot.slane %v3607_v52, %v410_v63 }
  0xa7   : > { %670 = vmatprep.mubr.bf16.mxu0 %v3170_v54  ;;  %743 = vmatprep.mubr.bf16.mxu1 %v3170_v54  ;;  %v3691_v48 = vrot.slane %v415_v49, %v410_v63 }
  0xa8   : > { %v3687_v51 = vrot.slane %v411_v60, %v410_v63 }
  0xae   : > { %671 = vmatmul.mubr.bf16.gmra.mrb[4].mxu0 %v2904_v61  ;;  %744 = vmatmul.mubr.bf16.gmra.mrb[4].mxu1 %v2904_v61  ;;  %v419_v61 = vrot.slane %v3607_v52, %v418_v53 }
  0xaf   : > { %680 = vmatprep.mubr.bf16.mxu0 %v3170_v54  ;;  %753 = vmatprep.mubr.bf16.mxu1 %v3170_v54 }
  0xb6   : > { %681 = vmatmul.mubr.bf16.gmra.mrb[8].mxu0 %v2905_v62  ;;  %754 = vmatmul.mubr.bf16.gmra.mrb[8].mxu1 %v2905_v62  ;;  %v423_v62 = vrot.slane %v3607_v52, %v422_v59 }
  0xb7   : > { %690 = vmatprep.mubr.bf16.mxu0 %v3170_v54  ;;  %763 = vmatprep.mubr.bf16.mxu1 %v3170_v54  ;;  %v3689_v54 = vrot.slane %v419_v61, %v410_v63 }
  0xbe   : > { %691 = vmatmul.mubr.bf16.gmra.mrb[12].mxu0 %v2906_v56  ;;  %764 = vmatmul.mubr.bf16.gmra.mrb[12].mxu1 %v2906_v56  ;;  %v3693_v56 = vrot.slane %v423_v62, %v410_v63 }
 0x179   : > { %v662_v58 = vpop.f32.mrb[0].mxu0  ;;  %v735_v50 = vpop.f32.mrb[0].mxu1 }
 0x17a   : > { %v663_v55 = vadd.f32 %v662_v58, %v3687_v51  ;;  %v736_v45 = vadd.f32 %v735_v50, %v3689_v54  ;;  %v664_v47 = vpop.f32.mrb[1].mxu0  ;;  %v737_v53 = vpop.f32.mrb[1].mxu1 }
 0x17b   : > { %v665_v57 = vadd.f32 %v664_v47, %v3691_v48  ;;  %v738_v59 = vadd.f32 %v737_v53, %v3693_v56  ;;  %v666_v60 = vpop.f32.mrb[2].mxu0  ;;  %v739_v44 = vpop.f32.mrb[2].mxu1 }
 0x17c   : > { %774 = vst [vmem:[#allocation2] sm:$0xff] %v663_v55  ;;  %776 = vst [vmem:[#allocation2 + $0x10] sm:$0xff] %v736_v45  ;;  %v667_v49 = vadd.f32 %v666_v60, %v3687_v51  ;;  %v740_v63 = vadd.f32 %v739_v44, %v3689_v54  ;;  %v668_v61 = vpop.f32.mrb[3].mxu0  ;;  %v741_v62 = vpop.f32.mrb[3].mxu1 }
 0x17d   : > { %775 = vst [vmem:[#allocation2 + $0x8] sm:$0xff] %v665_v57  ;;  %777 = vst [vmem:[#allocation2 + $0x18] sm:$0xff] %v738_v59  ;;  %v669_v50 = vadd.f32 %v668_v61, %v3691_v48  ;;  %v742_v58 = vadd.f32 %v741_v62, %v3693_v56 }
 0x17e   : > { %778 = vst [vmem:[#allocation2 + $0x20] sm:$0xff] %v667_v49  ;;  %780 = vst [vmem:[#allocation2 + $0x30] sm:$0xff] %v740_v63 }
 0x17f   : > { %779 = vst [vmem:[#allocation2 + $0x28] sm:$0xff] %v669_v50  ;;  %781 = vst [vmem:[#allocation2 + $0x38] sm:$0xff] %v742_v58 }
 0x181   : > { %v672_v47 = vpop.f32.mrb[4].mxu0  ;;  %v745_v53 = vpop.f32.mrb[4].mxu1 }
 0x182   : > { %v673_v45 = vadd.f32 %v672_v47, %v3687_v51  ;;  %v746_v55 = vadd.f32 %v745_v53, %v3689_v54  ;;  %v674_v60 = vpop.f32.mrb[5].mxu0  ;;  %v747_v44 = vpop.f32.mrb[5].mxu1 }
 0x183   : > { %v675_v46 = vadd.f32 %v674_v60, %v3691_v48  ;;  %v748_v57 = vadd.f32 %v747_v44, %v3693_v56  ;;  %v676_v59 = vpop.f32.mrb[6].mxu0  ;;  %v749_v61 = vpop.f32.mrb[6].mxu1 }
 0x184   : > { %782 = vst [vmem:[#allocation2 + $0x40] sm:$0xff] %v673_v45  ;;  %784 = vst [vmem:[#allocation2 + $0x50] sm:$0xff] %v746_v55  ;;  %v677_v49 = vadd.f32 %v676_v59, %v3687_v51  ;;  %v750_v63 = vadd.f32 %v749_v61, %v3689_v54  ;;  %v678_v62 = vpop.f32.mrb[7].mxu0  ;;  %v751_v50 = vpop.f32.mrb[7].mxu1 }
 0x185   : > { %783 = vst [vmem:[#allocation2 + $0x48] sm:$0xff] %v675_v46  ;;  %785 = vst [vmem:[#allocation2 + $0x58] sm:$0xff] %v748_v57  ;;  %v679_v58 = vadd.f32 %v678_v62, %v3691_v48  ;;  %v752_v47 = vadd.f32 %v751_v50, %v3693_v56 }
 0x186   : > { %786 = vst [vmem:[#allocation2 + $0x60] sm:$0xff] %v677_v49  ;;  %788 = vst [vmem:[#allocation2 + $0x70] sm:$0xff] %v750_v63 }
 0x187   : > { %787 = vst [vmem:[#allocation2 + $0x68] sm:$0xff] %v679_v58  ;;  %789 = vst [vmem:[#allocation2 + $0x78] sm:$0xff] %v752_v47 }
 0x189   : > { %v682_v53 = vpop.f32.mrb[8].mxu0  ;;  %v755_v60 = vpop.f32.mrb[8].mxu1 }
 0x18a   : > { %v683_v45 = vadd.f32 %v682_v53, %v3687_v51  ;;  %v756_v55 = vadd.f32 %v755_v60, %v3689_v54  ;;  %v684_v44 = vpop.f32.mrb[9].mxu0  ;;  %v757_v59 = vpop.f32.mrb[9].mxu1 }
 0x18b   : > { %v685_v61 = vadd.f32 %v684_v44, %v3691_v48  ;;  %v758_v46 = vadd.f32 %v757_v59, %v3693_v56  ;;  %v686_v57 = vpop.f32.mrb[10].mxu0  ;;  %v759_v62 = vpop.f32.mrb[10].mxu1 }
 0x18c   : > { %790 = vst [vmem:[#allocation2 + $0x80] sm:$0xff] %v683_v45  ;;  %792 = vst [vmem:[#allocation2 + $0x90] sm:$0xff] %v756_v55  ;;  %v687_v49 = vadd.f32 %v686_v57, %v3687_v51  ;;  %v760_v63 = vadd.f32 %v759_v62, %v3689_v54  ;;  %v688_v50 = vpop.f32.mrb[11].mxu0  ;;  %v761_v58 = vpop.f32.mrb[11].mxu1 }
 0x18d   : > { %791 = vst [vmem:[#allocation2 + $0x88] sm:$0xff] %v685_v61  ;;  %793 = vst [vmem:[#allocation2 + $0x98] sm:$0xff] %v758_v46  ;;  %v689_v47 = vadd.f32 %v688_v50, %v3691_v48  ;;  %v762_v53 = vadd.f32 %v761_v58, %v3693_v56 }
 0x18e   : > { %794 = vst [vmem:[#allocation2 + $0xa0] sm:$0xff] %v687_v49  ;;  %796 = vst [vmem:[#allocation2 + $0xb0] sm:$0xff] %v760_v63 }
 0x18f   : > { %795 = vst [vmem:[#allocation2 + $0xa8] sm:$0xff] %v689_v47  ;;  %797 = vst [vmem:[#allocation2 + $0xb8] sm:$0xff] %v762_v53 }
 0x191   : > { %v692_v60 = vpop.f32.mrb[12].mxu0  ;;  %v765_v44 = vpop.f32.mrb[12].mxu1 }
 0x192   : > { %v693_v45 = vadd.f32 %v692_v60, %v3687_v51  ;;  %v766_v55 = vadd.f32 %v765_v44, %v3689_v54  ;;  %v694_v59 = vpop.f32.mrb[13].mxu0  ;;  %v767_v57 = vpop.f32.mrb[13].mxu1 }
 0x193   : > { %v695_v62 = vadd.f32 %v694_v59, %v3691_v48  ;;  %v768_v61 = vadd.f32 %v767_v57, %v3693_v56  ;;  %v696_v46 = vpop.f32.mrb[14].mxu0  ;;  %v769_v50 = vpop.f32.mrb[14].mxu1 }
 0x194   : > { %798 = vst [vmem:[#allocation2 + $0xc0] sm:$0xff] %v693_v45  ;;  %800 = vst [vmem:[#allocation2 + $0xd0] sm:$0xff] %v766_v55  ;;  %v697_v49 = vadd.f32 %v696_v46, %v3687_v51  ;;  %v770_v63 = vadd.f32 %v769_v50, %v3689_v54  ;;  %v698_v58 = vpop.f32.mrb[15].mxu0  ;;  %v771_v47 = vpop.f32.mrb[15].mxu1 }
 0x195   : > { %799 = vst [vmem:[#allocation2 + $0xc8] sm:$0xff] %v695_v62  ;;  %801 = vst [vmem:[#allocation2 + $0xd8] sm:$0xff] %v768_v61  ;;  %v699_v53 = vadd.f32 %v698_v58, %v3691_v48  ;;  %v772_v60 = vadd.f32 %v771_v47, %v3693_v56 }
 0x196   : > { %802 = vst [vmem:[#allocation2 + $0xe0] sm:$0xff] %v697_v49  ;;  %804 = vst [vmem:[#allocation2 + $0xf0] sm:$0xff] %v770_v63 }
 0x197   : > { %803 = vst [vmem:[#allocation2 + $0xe8] sm:$0xff] %v699_v53  ;;  %805 = vst [vmem:[#allocation2 + $0xf8] sm:$0xff] %v772_v60 }
 0x198 PF: > { %p2668_p0 = scmp.le.s32.totalorder %s3297_s16, 0 }
 0x199   : > { %v2670_v51 = vcombine.high (!%p2668_p0), %v3409_v0, %v3415_v2  ;;  %v2672_v54 = vcombine.high (!%p2668_p0), %v3412_v1, %v3418_v3  ;;  %v2669_v44 = vcombine.low (!%p2668_p0), %v3409_v0, %v3415_v2  ;;  %v2671_v48 = vcombine.low (!%p2668_p0), %v3412_v1, %v3418_v3  ;;  %v813_v62 = vld [vmem:[#allocation3 + $0x18] sm:$0xff] (!%p2668_p0) }
 0x19a   : > { %809 = sbr.rel (%p2668_p0) target bundleno = 685 (0x2ad), region = 56  ;;  %v2674_v56 = vcombine.high (!%p2668_p0), %v3421_v4, %v3427_v6  ;;  %v2676_v45 = vcombine.high (!%p2668_p0), %v3424_v5, %v3430_v7  ;;  %v2673_v55 = vcombine.low (!%p2668_p0), %v3421_v4, %v3427_v6  ;;  %v2675_v59 = vcombine.low (!%p2668_p0), %v3424_v5, %v3430_v7  ;;  %v817_v46 = vld [vmem:[#allocation3 + $0x38] sm:$0xff] (!%p2668_p0) }
 0x19b   : > { %1019 = vmatprep.subr.bf16.mxu0 (!%p2668_p0), %v2670_v51  ;;  %1092 = vmatprep.subr.bf16.mxu1 (!%p2668_p0), %v2672_v54  ;;  %v2678_v0 = vcombine.high (!%p2668_p0), %v3433_v8, %v3439_v10  ;;  %v2680_v1 = vcombine.high (!%p2668_p0), %v3436_v9, %v3442_v11  ;;  %v3171_v2 = vmov (!%p2668_p0), 0   ;;  %v2677_v3 = vcombine.low (!%p2668_p0), %v3433_v8, %v3439_v10 }
 0x19c   : > { %1020 = vmatpush1.bf16.msra.mxu0 (!%p2668_p0), %v2669_v44  ;;  %1093 = vmatpush1.bf16.msra.mxu1 (!%p2668_p0), %v2671_v48  ;;  %v2679_v4 = vcombine.low (!%p2668_p0), %v3436_v9, %v3442_v11  ;;  %v2682_v5 = vcombine.high (!%p2668_p0), %v3445_v12, %v3451_v14  ;;  %v2684_v6 = vcombine.high (!%p2668_p0), %v3448_v13, %v3454_v15  ;;  %v823_v49 = vlaneseq (!%p2668_p0) }
 0x19d   : > { %1021 = vmatprep.subr.bf16.mxu0 (!%p2668_p0), %v2674_v56  ;;  %1094 = vmatprep.subr.bf16.mxu1 (!%p2668_p0), %v2676_v45  ;;  %v2681_v7 = vcombine.low (!%p2668_p0), %v3445_v12, %v3451_v14  ;;  %v2683_v57 = vcombine.low (!%p2668_p0), %v3448_v13, %v3454_v15  ;;  %v2686_v8 = vcombine.high (!%p2668_p0), %v3457_v16, %v3463_v18 }
 0x19e   : > { %1051 = vmatprep.mubr.bf16.mxu0 (!%p2668_p0), %v3171_v2  ;;  %1124 = vmatprep.mubr.bf16.mxu1 (!%p2668_p0), %v3171_v2  ;;  %v2688_v9 = vcombine.high (!%p2668_p0), %v3460_v17, %v3466_v19  ;;  %v2685_v10 = vcombine.low (!%p2668_p0), %v3457_v16, %v3463_v18  ;;  %v2687_v11 = vcombine.low (!%p2668_p0), %v3460_v17, %v3466_v19  ;;  %v824_v63 = vshrl.u32 (!%p2668_p0), %v823_v49, 7 }
 0x19f   : > { %v2690_v12 = vcombine.high (!%p2668_p0), %v3469_v20, %v3475_v22  ;;  %v2692_v13 = vcombine.high (!%p2668_p0), %v3472_v21, %v3478_v23  ;;  %v2689_v14 = vcombine.low (!%p2668_p0), %v3469_v20, %v3475_v22  ;;  %v2691_v15 = vcombine.low (!%p2668_p0), %v3472_v21, %v3478_v23 }
 0x1a0   : > { %1022 = vmatpush1.bf16.msra.mxu0 (!%p2668_p0), %v2673_v55  ;;  %1095 = vmatpush1.bf16.msra.mxu1 (!%p2668_p0), %v2675_v59  ;;  %v2694_v16 = vcombine.high (!%p2668_p0), %v3481_v24, %v3487_v26  ;;  %v2696_v17 = vcombine.high (!%p2668_p0), %v3484_v25, %v3490_v27  ;;  %v2693_v18 = vcombine.low (!%p2668_p0), %v3481_v24, %v3487_v26  ;;  %v810_v24 = vld [vmem:[#allocation3] sm:$0xff] (!%p2668_p0)  ;;  %v811_v26 = vld [vmem:[#allocation3 + $0x8] sm:$0xff] (!%p2668_p0)  ;;  %v825_v58 = vsub.s32 (!%p2668_p0), 0, %v824_v63 }
 0x1a1   : > { %1023 = vmatprep.subr.bf16.mxu0 %v2678_v0  ;;  %1096 = vmatprep.subr.bf16.mxu1 %v2680_v1  ;;  %v2695_v19 = vcombine.low %v3484_v25, %v3490_v27  ;;  %v2698_v20 = vcombine.high %v3493_v28, %v3499_v30  ;;  %v2700_v21 = vcombine.high %v3496_v29, %v3502_v31  ;;  %v812_v27 = vld [vmem:[#allocation3 + $0x10] sm:$0xff]  ;;  %v833_v47 = vsub.s32 4, %v824_v63 }
 0x1a2   : > { %v2697_v22 = vcombine.low %v3493_v28, %v3499_v30  ;;  %v2699_v23 = vcombine.low %v3496_v29, %v3502_v31  ;;  %v818_v25 = vpack.c.bf16 %v811_v26, %v810_v24  ;;  %v819_v61 = vpack.c.bf16 %v813_v62, %v812_v27  ;;  %v814_v28 = vld [vmem:[#allocation3 + $0x20] sm:$0xff]  ;;  %v815_v29 = vld [vmem:[#allocation3 + $0x28] sm:$0xff]  ;;  %v816_v31 = vld [vmem:[#allocation3 + $0x30] sm:$0xff] }
 0x1a3   : > { %v820_v30 = vpack.c.bf16 %v815_v29, %v814_v28  ;;  %v821_v50 = vpack.c.bf16 %v817_v46, %v816_v31  ;;  %v829_v53 = vsub.s32 2, %v824_v63  ;;  %v837_v60 = vsub.s32 6, %v824_v63 }
 0x1a4   : > { %1024 = vmatpush1.bf16.msra.mxu0 %v2677_v3  ;;  %1097 = vmatpush1.bf16.msra.mxu1 %v2679_v4  ;;  %v826_v51 = vrot.slane %v3607_v52, %v825_v58  ;;  %v834_v54 = vrot.slane %v3607_v52, %v833_v47 }
 0x1a5   : > { %1025 = vmatprep.subr.bf16.mxu0 %v2682_v5  ;;  %1098 = vmatprep.subr.bf16.mxu1 %v2684_v6  ;;  %v830_v44 = vrot.slane %v3607_v52, %v829_v53  ;;  %v838_v48 = vrot.slane %v3607_v52, %v837_v60 }
 0x1a6   : > { %v3804_v56 = vrot.slane %v826_v51, %v825_v58  ;;  %v3806_v45 = vrot.slane %v834_v54, %v825_v58 }
 0x1a7   : > { %v3808_v55 = vrot.slane %v830_v44, %v825_v58  ;;  %v3810_v59 = vrot.slane %v838_v48, %v825_v58 }
 0x1a8   : > { %1026 = vmatpush1.bf16.msra.mxu0 %v2681_v7  ;;  %1099 = vmatpush1.bf16.msra.mxu1 %v2683_v57 }
 0x1a9   : > { %1027 = vmatprep.subr.bf16.mxu0 %v2686_v8  ;;  %1100 = vmatprep.subr.bf16.mxu1 %v2688_v9 }
 0x1ac   : > { %1028 = vmatpush1.bf16.msra.mxu0 %v2685_v10  ;;  %1101 = vmatpush1.bf16.msra.mxu1 %v2687_v11 }
 0x1ad   : > { %1029 = vmatprep.subr.bf16.mxu0 %v2690_v12  ;;  %1102 = vmatprep.subr.bf16.mxu1 %v2692_v13 }
 0x1b0   : > { %1030 = vmatpush1.bf16.msra.mxu0 %v2689_v14  ;;  %1103 = vmatpush1.bf16.msra.mxu1 %v2691_v15 }
 0x1b1   : > { %1031 = vmatprep.subr.bf16.mxu0 %v2694_v16  ;;  %1104 = vmatprep.subr.bf16.mxu1 %v2696_v17 }
 0x1b4   : > { %1032 = vmatpush1.bf16.msra.mxu0 %v2693_v18  ;;  %1105 = vmatpush1.bf16.msra.mxu1 %v2695_v19 }
 0x1b5   : > { %1033 = vmatprep.subr.bf16.mxu0 %v2698_v20  ;;  %1106 = vmatprep.subr.bf16.mxu1 %v2700_v21 }
 0x1b8   : > { %1034 = vmatpush1.bf16.msra.mxu0 %v2697_v22  ;;  %1107 = vmatpush1.bf16.msra.mxu1 %v2699_v23 }
 0x1bb   : > { %1052 = vmatmul.mubr.bf16.vlgmr.msra.gmra.mrb[0].mxu0 %v818_v25  ;;  %1125 = vmatmul.mubr.bf16.vlgmr.msra.gmra.mrb[0].mxu1 %v818_v25 }
 0x1bc   : > { %1061 = vmatprep.mubr.bf16.mxu0 %v3171_v2  ;;  %1134 = vmatprep.mubr.bf16.mxu1 %v3171_v2 }
 0x1c3   : > { %1062 = vmatmul.mubr.bf16.gmra.mrb[4].mxu0 %v819_v61  ;;  %1135 = vmatmul.mubr.bf16.gmra.mrb[4].mxu1 %v819_v61 }
 0x1c4   : > { %1071 = vmatprep.mubr.bf16.mxu0 %v3171_v2  ;;  %1144 = vmatprep.mubr.bf16.mxu1 %v3171_v2 }
 0x1cb   : > { %1072 = vmatmul.mubr.bf16.gmra.mrb[8].mxu0 %v820_v30  ;;  %1145 = vmatmul.mubr.bf16.gmra.mrb[8].mxu1 %v820_v30 }
 0x1cc   : > { %1081 = vmatprep.mubr.bf16.mxu0 %v3171_v2  ;;  %1154 = vmatprep.mubr.bf16.mxu1 %v3171_v2 }
 0x1d3   : > { %1082 = vmatmul.mubr.bf16.gmra.mrb[12].mxu0 %v821_v50  ;;  %1155 = vmatmul.mubr.bf16.gmra.mrb[12].mxu1 %v821_v50 }
 0x28e   : > { %v1053_v0 = vpop.f32.mrb[0].mxu0  ;;  %v1126_v1 = vpop.f32.mrb[0].mxu1 }
 0x28f   : > { %v1054_v2 = vadd.f32 %v1053_v0, %v3804_v56  ;;  %v1127_v3 = vadd.f32 %v1126_v1, %v3806_v45  ;;  %v1055_v4 = vpop.f32.mrb[1].mxu0  ;;  %v1128_v5 = vpop.f32.mrb[1].mxu1 }
 0x290   : > { %v1056_v6 = vadd.f32 %v1055_v4, %v3808_v55  ;;  %v1129_v52 = vadd.f32 %v1128_v5, %v3810_v59  ;;  %v1057_v7 = vpop.f32.mrb[2].mxu0  ;;  %v1130_v57 = vpop.f32.mrb[2].mxu1 }
 0x291   : > { %1165 = vst [vmem:[#allocation2] sm:$0xff] %v1054_v2  ;;  %1167 = vst [vmem:[#allocation2 + $0x10] sm:$0xff] %v1127_v3  ;;  %v1058_v8 = vadd.f32 %v1057_v7, %v3804_v56  ;;  %v1131_v9 = vadd.f32 %v1130_v57, %v3806_v45  ;;  %v1059_v10 = vpop.f32.mrb[3].mxu0  ;;  %v1132_v11 = vpop.f32.mrb[3].mxu1 }
 0x292   : > { %1166 = vst [vmem:[#allocation2 + $0x8] sm:$0xff] %v1056_v6  ;;  %1168 = vst [vmem:[#allocation2 + $0x18] sm:$0xff] %v1129_v52  ;;  %v1060_v12 = vadd.f32 %v1059_v10, %v3808_v55  ;;  %v1133_v13 = vadd.f32 %v1132_v11, %v3810_v59 }
 0x293   : > { %1169 = vst [vmem:[#allocation2 + $0x20] sm:$0xff] %v1058_v8  ;;  %1171 = vst [vmem:[#allocation2 + $0x30] sm:$0xff] %v1131_v9 }
 0x294   : > { %1170 = vst [vmem:[#allocation2 + $0x28] sm:$0xff] %v1060_v12  ;;  %1172 = vst [vmem:[#allocation2 + $0x38] sm:$0xff] %v1133_v13 }
 0x296   : > { %v1063_v14 = vpop.f32.mrb[4].mxu0  ;;  %v1136_v15 = vpop.f32.mrb[4].mxu1 }
 0x297   : > { %v1064_v16 = vadd.f32 %v1063_v14, %v3804_v56  ;;  %v1137_v17 = vadd.f32 %v1136_v15, %v3806_v45  ;;  %v1065_v18 = vpop.f32.mrb[5].mxu0  ;;  %v1138_v19 = vpop.f32.mrb[5].mxu1 }
 0x298   : > { %v1066_v20 = vadd.f32 %v1065_v18, %v3808_v55  ;;  %v1139_v21 = vadd.f32 %v1138_v19, %v3810_v59  ;;  %v1067_v22 = vpop.f32.mrb[6].mxu0  ;;  %v1140_v23 = vpop.f32.mrb[6].mxu1 }
 0x299   : > { %1173 = vst [vmem:[#allocation2 + $0x40] sm:$0xff] %v1064_v16  ;;  %1175 = vst [vmem:[#allocation2 + $0x50] sm:$0xff] %v1137_v17  ;;  %v1068_v24 = vadd.f32 %v1067_v22, %v3804_v56  ;;  %v1141_v26 = vadd.f32 %v1140_v23, %v3806_v45  ;;  %v1069_v25 = vpop.f32.mrb[7].mxu0  ;;  %v1142_v27 = vpop.f32.mrb[7].mxu1 }
 0x29a   : > { %1174 = vst [vmem:[#allocation2 + $0x48] sm:$0xff] %v1066_v20  ;;  %1176 = vst [vmem:[#allocation2 + $0x58] sm:$0xff] %v1139_v21  ;;  %v1070_v62 = vadd.f32 %v1069_v25, %v3808_v55  ;;  %v1143_v61 = vadd.f32 %v1142_v27, %v3810_v59 }
 0x29b   : > { %1177 = vst [vmem:[#allocation2 + $0x60] sm:$0xff] %v1068_v24  ;;  %1179 = vst [vmem:[#allocation2 + $0x70] sm:$0xff] %v1141_v26 }
 0x29c   : > { %1178 = vst [vmem:[#allocation2 + $0x68] sm:$0xff] %v1070_v62  ;;  %1180 = vst [vmem:[#allocation2 + $0x78] sm:$0xff] %v1143_v61 }
 0x29e   : > { %v1073_v28 = vpop.f32.mrb[8].mxu0  ;;  %v1146_v29 = vpop.f32.mrb[8].mxu1 }
 0x29f   : > { %v1074_v30 = vadd.f32 %v1073_v28, %v3804_v56  ;;  %v1147_v31 = vadd.f32 %v1146_v29, %v3806_v45  ;;  %v1075_v46 = vpop.f32.mrb[9].mxu0  ;;  %v1148_v50 = vpop.f32.mrb[9].mxu1 }
 0x2a0   : > { %v1076_v49 = vadd.f32 %v1075_v46, %v3808_v55  ;;  %v1149_v63 = vadd.f32 %v1148_v50, %v3810_v59  ;;  %v1077_v58 = vpop.f32.mrb[10].mxu0  ;;  %v1150_v47 = vpop.f32.mrb[10].mxu1 }
 0x2a1   : > { %1181 = vst [vmem:[#allocation2 + $0x80] sm:$0xff] %v1074_v30  ;;  %1183 = vst [vmem:[#allocation2 + $0x90] sm:$0xff] %v1147_v31  ;;  %v1078_v53 = vadd.f32 %v1077_v58, %v3804_v56  ;;  %v1151_v60 = vadd.f32 %v1150_v47, %v3806_v45  ;;  %v1079_v51 = vpop.f32.mrb[11].mxu0  ;;  %v1152_v54 = vpop.f32.mrb[11].mxu1 }
 0x2a2   : > { %1182 = vst [vmem:[#allocation2 + $0x88] sm:$0xff] %v1076_v49  ;;  %1184 = vst [vmem:[#allocation2 + $0x98] sm:$0xff] %v1149_v63  ;;  %v1080_v44 = vadd.f32 %v1079_v51, %v3808_v55  ;;  %v1153_v48 = vadd.f32 %v1152_v54, %v3810_v59 }
 0x2a3   : > { %1185 = vst [vmem:[#allocation2 + $0xa0] sm:$0xff] %v1078_v53  ;;  %1187 = vst [vmem:[#allocation2 + $0xb0] sm:$0xff] %v1151_v60 }
 0x2a4   : > { %1186 = vst [vmem:[#allocation2 + $0xa8] sm:$0xff] %v1080_v44  ;;  %1188 = vst [vmem:[#allocation2 + $0xb8] sm:$0xff] %v1153_v48 }
 0x2a6   : > { %v1083_v0 = vpop.f32.mrb[12].mxu0  ;;  %v1156_v1 = vpop.f32.mrb[12].mxu1 }
 0x2a7   : > { %v1084_v2 = vadd.f32 %v1083_v0, %v3804_v56  ;;  %v1157_v3 = vadd.f32 %v1156_v1, %v3806_v45  ;;  %v1085_v4 = vpop.f32.mrb[13].mxu0  ;;  %v1158_v5 = vpop.f32.mrb[13].mxu1 }
 0x2a8   : > { %v1086_v6 = vadd.f32 %v1085_v4, %v3808_v55  ;;  %v1159_v52 = vadd.f32 %v1158_v5, %v3810_v59  ;;  %v1087_v7 = vpop.f32.mrb[14].mxu0  ;;  %v1160_v57 = vpop.f32.mrb[14].mxu1 }
 0x2a9   : > { %1189 = vst [vmem:[#allocation2 + $0xc0] sm:$0xff] %v1084_v2  ;;  %1191 = vst [vmem:[#allocation2 + $0xd0] sm:$0xff] %v1157_v3  ;;  %v1088_v8 = vadd.f32 %v1087_v7, %v3804_v56  ;;  %v1161_v9 = vadd.f32 %v1160_v57, %v3806_v45  ;;  %v1089_v10 = vpop.f32.mrb[15].mxu0  ;;  %v1162_v11 = vpop.f32.mrb[15].mxu1 }
 0x2aa   : > { %1190 = vst [vmem:[#allocation2 + $0xc8] sm:$0xff] %v1086_v6  ;;  %1192 = vst [vmem:[#allocation2 + $0xd8] sm:$0xff] %v1159_v52  ;;  %v1090_v12 = vadd.f32 %v1089_v10, %v3808_v55  ;;  %v1163_v13 = vadd.f32 %v1162_v11, %v3810_v59 }
 0x2ab   : > { %1193 = vst [vmem:[#allocation2 + $0xe0] sm:$0xff] %v1088_v8  ;;  %1195 = vst [vmem:[#allocation2 + $0xf0] sm:$0xff] %v1161_v9 }
 0x2ac   : > { %1194 = vst [vmem:[#allocation2 + $0xe8] sm:$0xff] %v1090_v12  ;;  %1196 = vst [vmem:[#allocation2 + $0xf8] sm:$0xff] %v1163_v13 }
 0x2ad PF: > { %v3846_v14 = vcombine.high %v3508_v32, %v3514_v34  ;;  %v3850_v56 = vcombine.low %v3508_v32, %v3514_v34  ;;  %v3854_v45 = vcombine.high %v3520_v36, %v3526_v38  ;;  %v3859_v55 = vcombine.high %v3511_v33, %v3517_v35  ;;  %v4375_v16 = vld [vmem:[#allocation14_spill] sm:$0xff]  ;;  %v4377_v18 = vld [vmem:[#allocation15_spill] sm:$0xff]  ;;  %v4378_v19 = vld [vmem:[#allocation13_spill] sm:$0xff] }
 0x2ae   : > { %v3863_v59 = vcombine.low %v3511_v33, %v3517_v35  ;;  %v3868_v32 = vcombine.low %v3520_v36, %v3526_v38  ;;  %v3872_v34 = vcombine.high %v3523_v37, %v3529_v39  ;;  %v3877_v15 = vcombine.high %v3532_v40, %v3538_v42  ;;  %v4379_v20 = vld [vmem:[#allocation18_spill] sm:$0xff]  ;;  %v4380_v21 = vld [vmem:[#allocation16_spill] sm:$0xff]  ;;  %v4382_v23 = vld [vmem:[#allocation17_spill] sm:$0xff] }
 0x2af   : > { %1361 = vmatprep.subr.bf16.mxu0 %v3846_v14  ;;  %1402 = vmatprep.subr.bf16.mxu1 %v3859_v55  ;;  %v3883_v33 = vcombine.low %v3523_v37, %v3529_v39  ;;  %v3888_v35 = vcombine.high %v3535_v41, %v3541_v43  ;;  %v3172_v36 = vmov 0   ;;  %v3894_v38 = vcombine.low %v3532_v40, %v3538_v42  ;;  %v4376_v37 = vld [vmem:[#allocation12_spill] sm:$0xff]  ;;  %v4383_v25 = vld [vmem:[#allocation22_spill] sm:$0xff]  ;;  %v4385_v28 = vld [vmem:[#allocation23_spill] sm:$0xff] }
 0x2b0   : > { %1362 = vmatpush1.bf16.msra.mxu0 %v3850_v56  ;;  %1403 = vmatpush1.bf16.msra.mxu1 %v3863_v59  ;;  %v3899_v39 = vcombine.high %v4376_v37, %v4375_v16  ;;  %v3905_v17 = vcombine.low %v3535_v41, %v3541_v43  ;;  %v3910_v40 = vcombine.high %v4378_v19, %v4377_v18  ;;  %v4381_v43 = vld [vmem:[#allocation19_spill] sm:$0xff]  ;;  %v4384_v27 = vld [vmem:[#allocation20_spill] sm:$0xff]  ;;  %v4386_v29 = vld [vmem:[#allocation21_spill] sm:$0xff] }
 0x2b1   : > { %1363 = vmatprep.subr.bf16.mxu0 %v3854_v45  ;;  %1404 = vmatprep.subr.bf16.mxu1 %v3872_v34  ;;  %v3915_v42 = vcombine.low %v4376_v37, %v4375_v16  ;;  %v3920_v22 = vcombine.high %v4380_v21, %v4379_v20  ;;  %v3925_v41 = vcombine.low %v4378_v19, %v4377_v18  ;;  %v4387_v46 = vld [vmem:[#allocation26_spill] sm:$0xff]  ;;  %v4388_v50 = vld [vmem:[#allocation24_spill] sm:$0xff]  ;;  %v4389_v58 = vld [vmem:[#allocation27_spill] sm:$0xff] }
 0x2b2   : > { %1393 = vmatprep.mubr.bf16.mxu0 %v3172_v36  ;;  %1434 = vmatprep.mubr.bf16.mxu1 %v3172_v36  ;;  %v3930_v24 = vcombine.high %v4382_v23, %v4381_v43  ;;  %v3935_v26 = vcombine.low %v4380_v21, %v4379_v20  ;;  %v3940_v62 = vcombine.high %v4384_v27, %v4383_v25  ;;  %v4390_v47 = vld [vmem:[#allocation25_spill] sm:$0xff]  ;;  %v4391_v51 = vld [vmem:[#allocation30_spill] sm:$0xff]  ;;  %v4392_v54 = vld [vmem:[#allocation28_spill] sm:$0xff] }
 0x2b3   : > { %v3945_v61 = vcombine.low %v4382_v23, %v4381_v43  ;;  %v3950_v30 = vcombine.high %v4386_v29, %v4385_v28  ;;  %v3955_v31 = vcombine.low %v4384_v27, %v4383_v25  ;;  %v3960_v49 = vcombine.high %v4388_v50, %v4387_v46  ;;  %v4393_v0 = vld [vmem:[#allocation31_spill] sm:$0xff]  ;;  %v4394_v1 = vld [vmem:[#allocation29_spill] sm:$0xff]  ;;  %v1197_v5 = vld [vmem:[#allocation2] sm:$0xff] }
 0x2b4   : > { %1364 = vmatpush1.bf16.msra.mxu0 %v3868_v32  ;;  %1405 = vmatpush1.bf16.msra.mxu1 %v3883_v33  ;;  %v3965_v63 = vcombine.low %v4386_v29, %v4385_v28  ;;  %v3970_v53 = vcombine.high %v4390_v47, %v4389_v58  ;;  %v3975_v60 = vcombine.low %v4388_v50, %v4387_v46  ;;  %v1198_v6 = vld [vmem:[#allocation2 + $0x8] sm:$0xff]  ;;  %v1199_v7 = vld [vmem:[#allocation2 + $0x10] sm:$0xff]  ;;  %v1200_v27 = vld [vmem:[#allocation2 + $0x18] sm:$0xff] }
 0x2b5   : > { %1365 = vmatprep.subr.bf16.mxu0 %v3877_v15  ;;  %1406 = vmatprep.subr.bf16.mxu1 %v3888_v35  ;;  %v3980_v44 = vcombine.high %v4392_v54, %v4391_v51  ;;  %v3985_v48 = vcombine.low %v4390_v47, %v4389_v58  ;;  %v3990_v2 = vcombine.high %v4394_v1, %v4393_v0 }
 0x2b6   : > { %v3995_v3 = vcombine.low %v4392_v54, %v4391_v51  ;;  %v4001_v4 = vcombine.low %v4394_v1, %v4393_v0 }
 0x2b8   : > { %1366 = vmatpush1.bf16.msra.mxu0 %v3894_v38  ;;  %1407 = vmatpush1.bf16.msra.mxu1 %v3905_v17 }
 0x2b9   : > { %1367 = vmatprep.subr.bf16.mxu0 %v3899_v39  ;;  %1408 = vmatprep.subr.bf16.mxu1 %v3910_v40 }
 0x2bc   : > { %1368 = vmatpush1.bf16.msra.mxu0 %v3915_v42  ;;  %1409 = vmatpush1.bf16.msra.mxu1 %v3925_v41 }
 0x2bd   : > { %1369 = vmatprep.subr.bf16.mxu0 %v3920_v22  ;;  %1410 = vmatprep.subr.bf16.mxu1 %v3930_v24 }
 0x2c0   : > { %1370 = vmatpush1.bf16.msra.mxu0 %v3935_v26  ;;  %1411 = vmatpush1.bf16.msra.mxu1 %v3945_v61 }
 0x2c1   : > { %1371 = vmatprep.subr.bf16.mxu0 %v3940_v62  ;;  %1412 = vmatprep.subr.bf16.mxu1 %v3950_v30 }
 0x2c4   : > { %1372 = vmatpush1.bf16.msra.mxu0 %v3955_v31  ;;  %1413 = vmatpush1.bf16.msra.mxu1 %v3965_v63 }
 0x2c5   : > { %1373 = vmatprep.subr.bf16.mxu0 %v3960_v49  ;;  %1414 = vmatprep.subr.bf16.mxu1 %v3970_v53 }
 0x2c8   : > { %1374 = vmatpush1.bf16.msra.mxu0 %v3975_v60  ;;  %1415 = vmatpush1.bf16.msra.mxu1 %v3985_v48 }
 0x2c9   : > { %1375 = vmatprep.subr.bf16.mxu0 %v3980_v44  ;;  %1416 = vmatprep.subr.bf16.mxu1 %v3990_v2 }
 0x2cc   : > { %1376 = vmatpush1.bf16.msra.mxu0 %v3995_v3  ;;  %1417 = vmatpush1.bf16.msra.mxu1 %v4001_v4 }
 0x2cd   : > { %1488 = vmatprep.subr.bf16.mxu0 %v3846_v14  ;;  %1529 = vmatprep.subr.bf16.mxu1 %v3859_v55 }
 0x2cf   : > { %1394 = vmatmul.mubr.bf16.vlgmr.msra.gmra.mrb[0].mxu0 %v3172_v36  ;;  %1435 = vmatmul.mubr.bf16.vlgmr.msra.gmra.mrb[0].mxu1 %v3172_v36 }
 0x2d0   : > { %1489 = vmatpush1.bf16.msra.mxu0 %v3850_v56  ;;  %1520 = vmatprep.mubr.bf16.mxu0 %v3172_v36 }
 0x2d1   : > { %1490 = vmatprep.subr.bf16.mxu0 %v3854_v45  ;;  %1530 = vmatpush1.bf16.msra.mxu1 %v3863_v59 }
 0x2d2   : > { %1561 = vmatprep.mubr.bf16.mxu1 %v3172_v36  ;;  %1531 = vmatprep.subr.bf16.mxu1 %v3872_v34 }
 0x2d4   : > { %1491 = vmatpush1.bf16.msra.mxu0 %v3868_v32 }
 0x2d5   : > { %1492 = vmatprep.subr.bf16.mxu0 %v3877_v15  ;;  %1532 = vmatpush1.bf16.msra.mxu1 %v3883_v33 }
 0x2d6   : > { %1533 = vmatprep.subr.bf16.mxu1 %v3888_v35 }
 0x2d8   : > { %1493 = vmatpush1.bf16.msra.mxu0 %v3894_v38 }
 0x2d9   : > { %1494 = vmatprep.subr.bf16.mxu0 %v3899_v39  ;;  %1534 = vmatpush1.bf16.msra.mxu1 %v3905_v17 }
 0x2da   : > { %1535 = vmatprep.subr.bf16.mxu1 %v3910_v40 }
 0x2dc   : > { %1495 = vmatpush1.bf16.msra.mxu0 %v3915_v42 }
 0x2dd   : > { %1496 = vmatprep.subr.bf16.mxu0 %v3920_v22  ;;  %1536 = vmatpush1.bf16.msra.mxu1 %v3925_v41 }
 0x2de   : > { %1537 = vmatprep.subr.bf16.mxu1 %v3930_v24 }
 0x2e0   : > { %1497 = vmatpush1.bf16.msra.mxu0 %v3935_v26 }
 0x2e1   : > { %1498 = vmatprep.subr.bf16.mxu0 %v3940_v62  ;;  %1538 = vmatpush1.bf16.msra.mxu1 %v3945_v61 }
 0x2e2   : > { %1539 = vmatprep.subr.bf16.mxu1 %v3950_v30 }
 0x2e4   : > { %1499 = vmatpush1.bf16.msra.mxu0 %v3955_v31 }
 0x2e5   : > { %1500 = vmatprep.subr.bf16.mxu0 %v3960_v49  ;;  %1540 = vmatpush1.bf16.msra.mxu1 %v3965_v63 }
 0x2e6   : > { %1541 = vmatprep.subr.bf16.mxu1 %v3970_v53 }
 0x2e8   : > { %1501 = vmatpush1.bf16.msra.mxu0 %v3975_v60 }
 0x2e9   : > { %1502 = vmatprep.subr.bf16.mxu0 %v3980_v44  ;;  %1542 = vmatpush1.bf16.msra.mxu1 %v3985_v48 }
 0x2ea   : > { %1543 = vmatprep.subr.bf16.mxu1 %v3990_v2 }
 0x2ec   : > { %1503 = vmatpush1.bf16.msra.mxu0 %v3995_v3 }
 0x2ed   : > { %1615 = vmatprep.subr.bf16.mxu0 %v3846_v14  ;;  %1544 = vmatpush1.bf16.msra.mxu1 %v4001_v4 }
 0x2ee   : > { %1656 = vmatprep.subr.bf16.mxu1 %v3859_v55 }
 0x3a2   : > { %v1395_v52 = vpop.f32.mrb[0].mxu0  ;;  %v1436_v11 = vpop.f32.mrb[0].mxu1 }
 0x3a3   : > { %v1443_v57 = vadd.f32 %v1395_v52, %v1197_v5  ;;  %v1397_v8 = vpop.f32.mrb[1].mxu0  ;;  %v1445_v16 = vadd.f32 %v1436_v11, %v1199_v7  ;;  %v1438_v37 = vpop.f32.mrb[1].mxu1 }
 0x3a4   : > { %v1444_v9 = vadd.f32 %v1397_v8, %v1198_v6  ;;  %v1399_v10 = vpop.f32.mrb[2].mxu0  ;;  %v1440_v19 = vpop.f32.mrb[2].mxu1  ;;  %v1446_v28 = vadd.f32 %v1438_v37, %v1200_v27 }
 0x3a5   : > { %v1447_v12 = vpack.c.bf16 %v1443_v57, %v1443_v57  ;;  %v1400_v13 = vpop.f32.mrb[3].mxu0  ;;  %v1449_v21 = vpack.c.bf16 %v1445_v16, %v1445_v16  ;;  %v1441_v43 = vpop.f32.mrb[3].mxu1  ;;  %v1484_v19 = vld [vmem:[#allocation2 + $0x20] sm:$0xff] }
 0x3a6   : > { %v1448_v18 = vpack.c.bf16 %v1444_v9, %v1444_v9  ;;  %v1450_v58 = vpack.c.bf16 %v1446_v28, %v1446_v28 }
 0x3a7   : > { %v2733_v20 = vmul.bf16 3216621497, %v1447_v12  ;;  %v2735_v25 = vmul.bf16 3216621497, %v1449_v21 }
 0x3a8   : > { %v2734_v23 = vmul.bf16 3216621497, %v1448_v18 }
 0x3a9   : > { %2907 = vpow.bf16 %v2733_v20  ;;  %v1485_v20 = vld [vmem:[#allocation2 + $0x28] sm:$0xff] }
 0x3aa   : > { %2909 = vpow.bf16 %v2734_v23 }
 0x3ab   : > { %2911 = vpow.bf16 %v2735_v25  ;;  %v1486_v25 = vld [vmem:[#allocation2 + $0x30] sm:$0xff] }
 0x3b4   : > { %v2908_v29 = vpop.eup %2907 }
 0x3b5   : > { %v2910_v46 = vpop.eup %2909  ;;  %v1463_v50 = vadd.bf16 1065369472, %v2908_v29 }
 0x3b6   : > { %v1464_v47 = vadd.bf16 1065369472, %v2910_v46  ;;  %v2912_v51 = vpop.eup %2911 }
 0x3b7   : > { %2913 = vrcp.bf16 %v1463_v50  ;;  %v1465_v54 = vadd.bf16 1065369472, %v2912_v51 }
 0x3b8   : > { %2915 = vrcp.bf16 %v1464_v47 }
 0x3b9   : > { %2917 = vtanh.bf16 %v1450_v58 }
 0x3ba   : > { %2919 = vrcp.bf16 %v1465_v54 }
 0x3c2   : > { %v2914_v0 = vpop.eup %2913 }
 0x3c3   : > { %v2916_v1 = vpop.eup %2915  ;;  %v1467_v5 = vmul.bf16 1065369472, %v2914_v0 }
 0x3c4   : > { %v2918_v6 = vpop.eup %2917  ;;  %v1469_v52 = vmul.bf16 1065369472, %v2916_v1 }
 0x3c5   : > { %v1475_v7 = vmul.bf16 %v2918_v6, %v1467_v5  ;;  %v2920_v11 = vpop.eup %2919 }
 0x3c6   : > { %v1473_v57 = vunpack.c.l.bf16 %v1469_v52  ;;  %v1471_v12 = vmul.bf16 1065369472, %v2920_v11  ;;  %v1487_v52 = vld [vmem:[#allocation2 + $0x38] sm:$0xff] }
 0x3c7   : > { %v1476_v8 = vunpack.c.l.bf16 %v1475_v7 }
 0x3c8   : > { %v1474_v9 = vmul.f32 0.0, %v1473_v57  ;;  %v1479_v13 = vunpack.c.l.bf16 %v1471_v12 }
 0x3ca   : > { %v4044_v10 = vadd.f32 %v1476_v8, %v1474_v9 }
 0x3cc   : > { %2921 = vtanh.f32 %v4044_v10 }
 0x3d6   : > { %v2922_v16 = vpop.eup %2921 }
 0x3d7   : > { %v4047_v37 = vmul.f32 %v2922_v16, %v1479_v13 }
 0x3d9   : > { %1481 = vst [vmem:[#allocation3] sm:$0xff] %v4047_v37  ;;  %v1483_v18 = vpack.c.bf16 %v4047_v37, %v4047_v37 }
 0x3db   : > { %1521 = vmatmul.mubr.bf16.vlgmr.msra.gmra.mrb[4].mxu0 %v1483_v18  ;;  %1562 = vmatmul.mubr.bf16.vlgmr.msra.gmra.mrb[4].mxu1 %v1483_v18 }
 0x3dc   : > { %1616 = vmatpush1.bf16.msra.mxu0 %v3850_v56  ;;  %1657 = vmatpush1.bf16.msra.mxu1 %v3863_v59 }
 0x3dd   : > { %1617 = vmatprep.subr.bf16.mxu0 %v3854_v45  ;;  %1658 = vmatprep.subr.bf16.mxu1 %v3872_v34 }
 0x3de   : > { %1647 = vmatprep.mubr.bf16.mxu0 %v3172_v36  ;;  %1688 = vmatprep.mubr.bf16.mxu1 %v3172_v36 }
 0x3e0   : > { %1618 = vmatpush1.bf16.msra.mxu0 %v3868_v32  ;;  %1659 = vmatpush1.bf16.msra.mxu1 %v3883_v33 }
 0x3e1   : > { %1619 = vmatprep.subr.bf16.mxu0 %v3877_v15  ;;  %1660 = vmatprep.subr.bf16.mxu1 %v3888_v35 }
 0x3e4   : > { %1620 = vmatpush1.bf16.msra.mxu0 %v3894_v38  ;;  %1661 = vmatpush1.bf16.msra.mxu1 %v3905_v17 }
 0x3e5   : > { %1621 = vmatprep.subr.bf16.mxu0 %v3899_v39  ;;  %1662 = vmatprep.subr.bf16.mxu1 %v3910_v40 }
 0x3e8   : > { %1622 = vmatpush1.bf16.msra.mxu0 %v3915_v42  ;;  %1663 = vmatpush1.bf16.msra.mxu1 %v3925_v41 }
 0x3e9   : > { %1623 = vmatprep.subr.bf16.mxu0 %v3920_v22  ;;  %1664 = vmatprep.subr.bf16.mxu1 %v3930_v24 }
 0x3ec   : > { %1624 = vmatpush1.bf16.msra.mxu0 %v3935_v26  ;;  %1665 = vmatpush1.bf16.msra.mxu1 %v3945_v61 }
 0x3ed   : > { %1625 = vmatprep.subr.bf16.mxu0 %v3940_v62  ;;  %1666 = vmatprep.subr.bf16.mxu1 %v3950_v30 }
 0x3f0   : > { %1626 = vmatpush1.bf16.msra.mxu0 %v3955_v31  ;;  %1667 = vmatpush1.bf16.msra.mxu1 %v3965_v63 }
 0x3f1   : > { %1627 = vmatprep.subr.bf16.mxu0 %v3960_v49  ;;  %1668 = vmatprep.subr.bf16.mxu1 %v3970_v53 }
 0x3f4   : > { %1628 = vmatpush1.bf16.msra.mxu0 %v3975_v60  ;;  %1669 = vmatpush1.bf16.msra.mxu1 %v3985_v48 }
 0x3f5   : > { %1629 = vmatprep.subr.bf16.mxu0 %v3980_v44  ;;  %1670 = vmatprep.subr.bf16.mxu1 %v3990_v2 }
 0x3f8   : > { %1630 = vmatpush1.bf16.msra.mxu0 %v3995_v3  ;;  %1671 = vmatpush1.bf16.msra.mxu1 %v4001_v4 }
 0x3f9   : > { %1742 = vmatprep.subr.bf16.mxu0 %v3846_v14  ;;  %1783 = vmatprep.subr.bf16.mxu1 %v3859_v55 }
 0x4ae   : > { %v1522_v21 = vpop.f32.mrb[4].mxu0  ;;  %v1563_v43 = vpop.f32.mrb[4].mxu1 }
 0x4af   : > { %v1570_v23 = vadd.f32 %v1522_v21, %v1484_v19  ;;  %v1524_v27 = vpop.f32.mrb[5].mxu0  ;;  %v1565_v28 = vpop.f32.mrb[5].mxu1  ;;  %v1572_v54 = vadd.f32 %v1563_v43, %v1486_v25 }
 0x4b0   : > { %v1571_v29 = vadd.f32 %v1524_v27, %v1485_v20  ;;  %v1526_v46 = vpop.f32.mrb[6].mxu0  ;;  %v1567_v50 = vpop.f32.mrb[6].mxu1  ;;  %v1573_v57 = vadd.f32 %v1565_v28, %v1487_v52 }
 0x4b1   : > { %v1574_v58 = vpack.c.bf16 %v1570_v23, %v1570_v23  ;;  %v1527_v47 = vpop.f32.mrb[7].mxu0  ;;  %v1568_v51 = vpop.f32.mrb[7].mxu1  ;;  %v1576_v6 = vpack.c.bf16 %v1572_v54, %v1572_v54 }
 0x4b2   : > { %v1575_v0 = vpack.c.bf16 %v1571_v29, %v1571_v29  ;;  %v1577_v9 = vpack.c.bf16 %v1573_v57, %v1573_v57  ;;  %v1613_v57 = vld [vmem:[#allocation2 + $0x50] sm:$0xff] }
 0x4b3   : > { %v2736_v1 = vmul.bf16 3216621497, %v1574_v58  ;;  %v2738_v7 = vmul.bf16 3216621497, %v1576_v6 }
 0x4b4   : > { %v2737_v5 = vmul.bf16 3216621497, %v1575_v0 }
 0x4b5   : > { %2923 = vpow.bf16 %v2736_v1 }
 0x4b6   : > { %2925 = vpow.bf16 %v2737_v5 }
 0x4b7   : > { %2927 = vpow.bf16 %v2738_v7 }
 0x4c0   : > { %v2924_v8 = vpop.eup %2923 }
 0x4c1   : > { %v1590_v11 = vadd.bf16 1065369472, %v2924_v8  ;;  %v2926_v12 = vpop.eup %2925 }
 0x4c2   : > { %v1591_v13 = vadd.bf16 1065369472, %v2926_v12  ;;  %v2928_v16 = vpop.eup %2927 }
 0x4c3   : > { %2929 = vrcp.bf16 %v1590_v11  ;;  %v1592_v18 = vadd.bf16 1065369472, %v2928_v16 }
 0x4c4   : > { %2931 = vtanh.bf16 %v1577_v9 }
 0x4c5   : > { %2933 = vrcp.bf16 %v1591_v13 }
 0x4c6   : > { %2935 = vrcp.bf16 %v1592_v18 }
 0x4ce   : > { %v2930_v19 = vpop.eup %2929 }
 0x4cf   : > { %v2932_v20 = vpop.eup %2931  ;;  %v1594_v21 = vmul.bf16 1065369472, %v2930_v19 }
 0x4d0   : > { %v2934_v43 = vpop.eup %2933 }
 0x4d1   : > { %v1596_v23 = vmul.bf16 1065369472, %v2934_v43  ;;  %v1602_v25 = vmul.bf16 %v2932_v20, %v1594_v21  ;;  %v2936_v58 = vpop.eup %2935 }
 0x4d2   : > { %v1598_v47 = vmul.bf16 1065369472, %v2936_v58 }
 0x4d3   : > { %v1600_v27 = vunpack.c.l.bf16 %v1596_v23  ;;  %v1603_v28 = vunpack.c.l.bf16 %v1602_v25 }
 0x4d4   : > { %v1606_v51 = vunpack.c.l.bf16 %v1598_v47 }
 0x4d5   : > { %v1601_v29 = vmul.f32 %v1600_v27, %v4044_v10  ;;  %v1614_v27 = vld [vmem:[#allocation2 + $0x58] sm:$0xff] }
 0x4d7   : > { %v4087_v46 = vadd.f32 %v1603_v28, %v1601_v29 }
 0x4d9   : > { %v2818_v50 = vpack.c.bf16 %v4087_v46, %v4044_v10  ;;  %2937 = vtanh.f32 %v4087_v46  ;;  %v1611_v10 = vld [vmem:[#allocation2 + $0x40] sm:$0xff] }
 0x4db   : > { %2819 = vst [vmem:[%s3406_s23] sm:$0xff] %v2818_v50  }
 0x4e3   : > { %v2938_v54 = vpop.eup %2937 }
 0x4e4   : > { %v1607_v0 = vmul.f32 %v2938_v54, %v1606_v51 }
 0x4e6   : > { %1608 = vst [vmem:[#allocation3 + $0x8] sm:$0xff] %v1607_v0  ;;  %v1610_v1 = vpack.c.bf16 %v1607_v0, %v1607_v0  ;;  %v2798_v5 = vpack.c.bf16 %v1607_v0, %v4047_v37  ;;  %v1612_v37 = vld [vmem:[#allocation2 + $0x48] sm:$0xff] }
 0x4e8   : > { %1648 = vmatmul.mubr.bf16.vlgmr.msra.gmra.mrb[8].mxu0 %v1610_v1  ;;  %2799 = vst [vmem:[%s3401_s21] sm:$0xff] %v2798_v5   ;;  %1689 = vmatmul.mubr.bf16.vlgmr.msra.gmra.mrb[8].mxu1 %v1610_v1 }
 0x4e9   : > { %1743 = vmatpush1.bf16.msra.mxu0 %v3850_v56  ;;  %1784 = vmatpush1.bf16.msra.mxu1 %v3863_v59 }
 0x4ea   : > { %1744 = vmatprep.subr.bf16.mxu0 %v3854_v45  ;;  %1785 = vmatprep.subr.bf16.mxu1 %v3872_v34 }
 0x4eb   : > { %1774 = vmatprep.mubr.bf16.mxu0 %v3172_v36  ;;  %1815 = vmatprep.mubr.bf16.mxu1 %v3172_v36 }
 0x4ed   : > { %1745 = vmatpush1.bf16.msra.mxu0 %v3868_v32  ;;  %1786 = vmatpush1.bf16.msra.mxu1 %v3883_v33 }
 0x4ee   : > { %1746 = vmatprep.subr.bf16.mxu0 %v3877_v15  ;;  %1787 = vmatprep.subr.bf16.mxu1 %v3888_v35 }
 0x4f1   : > { %1747 = vmatpush1.bf16.msra.mxu0 %v3894_v38  ;;  %1788 = vmatpush1.bf16.msra.mxu1 %v3905_v17 }
 0x4f2   : > { %1748 = vmatprep.subr.bf16.mxu0 %v3899_v39  ;;  %1789 = vmatprep.subr.bf16.mxu1 %v3910_v40 }
 0x4f5   : > { %1749 = vmatpush1.bf16.msra.mxu0 %v3915_v42  ;;  %1790 = vmatpush1.bf16.msra.mxu1 %v3925_v41 }
 0x4f6   : > { %1750 = vmatprep.subr.bf16.mxu0 %v3920_v22  ;;  %1791 = vmatprep.subr.bf16.mxu1 %v3930_v24 }
 0x4f9   : > { %1751 = vmatpush1.bf16.msra.mxu0 %v3935_v26  ;;  %1792 = vmatpush1.bf16.msra.mxu1 %v3945_v61 }
 0x4fa   : > { %1752 = vmatprep.subr.bf16.mxu0 %v3940_v62  ;;  %1793 = vmatprep.subr.bf16.mxu1 %v3950_v30 }
 0x4fd   : > { %1753 = vmatpush1.bf16.msra.mxu0 %v3955_v31  ;;  %1794 = vmatpush1.bf16.msra.mxu1 %v3965_v63 }
 0x4fe   : > { %1754 = vmatprep.subr.bf16.mxu0 %v3960_v49  ;;  %1795 = vmatprep.subr.bf16.mxu1 %v3970_v53 }
 0x501   : > { %1755 = vmatpush1.bf16.msra.mxu0 %v3975_v60  ;;  %1796 = vmatpush1.bf16.msra.mxu1 %v3985_v48 }
 0x502   : > { %1756 = vmatprep.subr.bf16.mxu0 %v3980_v44  ;;  %1797 = vmatprep.subr.bf16.mxu1 %v3990_v2 }
 0x505   : > { %1757 = vmatpush1.bf16.msra.mxu0 %v3995_v3  ;;  %1798 = vmatpush1.bf16.msra.mxu1 %v4001_v4 }
 0x506   : > { %1869 = vmatprep.subr.bf16.mxu0 %v3846_v14  ;;  %1910 = vmatprep.subr.bf16.mxu1 %v3859_v55 }
 0x5bb   : > { %v1649_v6 = vpop.f32.mrb[8].mxu0  ;;  %v1690_v52 = vpop.f32.mrb[8].mxu1 }
 0x5bc   : > { %v1697_v7 = vadd.f32 %v1649_v6, %v1611_v10  ;;  %v1651_v8 = vpop.f32.mrb[9].mxu0  ;;  %v1692_v9 = vpop.f32.mrb[9].mxu1  ;;  %v1699_v20 = vadd.f32 %v1690_v52, %v1613_v57 }
 0x5bd   : > { %v1698_v11 = vadd.f32 %v1651_v8, %v1612_v37  ;;  %v1653_v12 = vpop.f32.mrb[10].mxu0  ;;  %v1694_v13 = vpop.f32.mrb[10].mxu1  ;;  %v1700_v29 = vadd.f32 %v1692_v9, %v1614_v27  ;;  %v1740_v27 = vld [vmem:[#allocation2 + $0x70] sm:$0xff] }
 0x5be   : > { %v1701_v16 = vpack.c.bf16 %v1697_v7, %v1697_v7  ;;  %v1654_v18 = vpop.f32.mrb[11].mxu0  ;;  %v1695_v19 = vpop.f32.mrb[11].mxu1  ;;  %v1703_v25 = vpack.c.bf16 %v1699_v20, %v1699_v20 }
 0x5bf   : > { %v1702_v21 = vpack.c.bf16 %v1698_v11, %v1698_v11  ;;  %v1704_v58 = vpack.c.bf16 %v1700_v29, %v1700_v29 }
 0x5c0   : > { %v2739_v43 = vmul.bf16 3216621497, %v1701_v16  ;;  %v2741_v28 = vmul.bf16 3216621497, %v1703_v25 }
 0x5c1   : > { %v2740_v23 = vmul.bf16 3216621497, %v1702_v21  ;;  %v1739_v21 = vld [vmem:[#allocation2 + $0x68] sm:$0xff] }
 0x5c2   : > { %2939 = vpow.bf16 %v2739_v43 }
 0x5c3   : > { %2941 = vpow.bf16 %v2740_v23 }
 0x5c4   : > { %2943 = vpow.bf16 %v2741_v28 }
 0x5cd   : > { %v2940_v50 = vpop.eup %2939 }
 0x5ce   : > { %v1717_v47 = vadd.bf16 1065369472, %v2940_v50  ;;  %v2942_v51 = vpop.eup %2941 }
 0x5cf   : > { %v1718_v54 = vadd.bf16 1065369472, %v2942_v51  ;;  %v2944_v0 = vpop.eup %2943 }
 0x5d0   : > { %2945 = vrcp.bf16 %v1717_v47  ;;  %v1719_v1 = vadd.bf16 1065369472, %v2944_v0 }
 0x5d1   : > { %2947 = vtanh.bf16 %v1704_v58 }
 0x5d2   : > { %2949 = vrcp.bf16 %v1718_v54 }
 0x5d3   : > { %2951 = vrcp.bf16 %v1719_v1 }
 0x5db   : > { %v2946_v5 = vpop.eup %2945 }
 0x5dc   : > { %v2948_v10 = vpop.eup %2947  ;;  %v1721_v37 = vmul.bf16 1065369472, %v2946_v5 }
 0x5dd   : > { %v2950_v6 = vpop.eup %2949 }
 0x5de   : > { %v1723_v52 = vmul.bf16 1065369472, %v2950_v6  ;;  %v1729_v7 = vmul.bf16 %v2948_v10, %v1721_v37  ;;  %v2952_v12 = vpop.eup %2951 }
 0x5df   : > { %v1725_v13 = vmul.bf16 1065369472, %v2952_v12 }
 0x5e0   : > { %v1727_v57 = vunpack.c.l.bf16 %v1723_v52  ;;  %v1730_v8 = vunpack.c.l.bf16 %v1729_v7  ;;  %v1741_v52 = vld [vmem:[#allocation2 + $0x78] sm:$0xff] }
 0x5e1   : > { %v1733_v16 = vunpack.c.l.bf16 %v1725_v13 }
 0x5e2   : > { %v1728_v9 = vmul.f32 %v1727_v57, %v4087_v46  ;;  %v1738_v46 = vld [vmem:[#allocation2 + $0x60] sm:$0xff] }
 0x5e4   : > { %v4130_v11 = vadd.f32 %v1730_v8, %v1728_v9 }
 0x5e6   : > { %2953 = vtanh.f32 %v4130_v11 }
 0x5f0   : > { %v2954_v18 = vpop.eup %2953 }
 0x5f1   : > { %v4133_v19 = vmul.f32 %v2954_v18, %v1733_v16 }
 0x5f3   : > { %1735 = vst [vmem:[#allocation3 + $0x10] sm:$0xff] %v4133_v19  ;;  %v1737_v20 = vpack.c.bf16 %v4133_v19, %v4133_v19 }
 0x5f5   : > { %1775 = vmatmul.mubr.bf16.vlgmr.msra.gmra.mrb[12].mxu0 %v1737_v20  ;;  %1816 = vmatmul.mubr.bf16.vlgmr.msra.gmra.mrb[12].mxu1 %v1737_v20 }
 0x5f6   : > { %1870 = vmatpush1.bf16.msra.mxu0 %v3850_v56  ;;  %1911 = vmatpush1.bf16.msra.mxu1 %v3863_v59 }
 0x5f7   : > { %1871 = vmatprep.subr.bf16.mxu0 %v3854_v45  ;;  %1912 = vmatprep.subr.bf16.mxu1 %v3872_v34 }
 0x5f8   : > { %1901 = vmatprep.mubr.bf16.mxu0 %v3172_v36  ;;  %1942 = vmatprep.mubr.bf16.mxu1 %v3172_v36 }
 0x5fa   : > { %1872 = vmatpush1.bf16.msra.mxu0 %v3868_v32  ;;  %1913 = vmatpush1.bf16.msra.mxu1 %v3883_v33 }
 0x5fb   : > { %1873 = vmatprep.subr.bf16.mxu0 %v3877_v15  ;;  %1914 = vmatprep.subr.bf16.mxu1 %v3888_v35 }
 0x5fe   : > { %1874 = vmatpush1.bf16.msra.mxu0 %v3894_v38  ;;  %1915 = vmatpush1.bf16.msra.mxu1 %v3905_v17 }
 0x5ff   : > { %1875 = vmatprep.subr.bf16.mxu0 %v3899_v39  ;;  %1916 = vmatprep.subr.bf16.mxu1 %v3910_v40 }
 0x602   : > { %1876 = vmatpush1.bf16.msra.mxu0 %v3915_v42  ;;  %1917 = vmatpush1.bf16.msra.mxu1 %v3925_v41 }
 0x603   : > { %1877 = vmatprep.subr.bf16.mxu0 %v3920_v22  ;;  %1918 = vmatprep.subr.bf16.mxu1 %v3930_v24 }
 0x606   : > { %1878 = vmatpush1.bf16.msra.mxu0 %v3935_v26  ;;  %1919 = vmatpush1.bf16.msra.mxu1 %v3945_v61 }
 0x607   : > { %1879 = vmatprep.subr.bf16.mxu0 %v3940_v62  ;;  %1920 = vmatprep.subr.bf16.mxu1 %v3950_v30 }
 0x60a   : > { %1880 = vmatpush1.bf16.msra.mxu0 %v3955_v31  ;;  %1921 = vmatpush1.bf16.msra.mxu1 %v3965_v63 }
 0x60b   : > { %1881 = vmatprep.subr.bf16.mxu0 %v3960_v49  ;;  %1922 = vmatprep.subr.bf16.mxu1 %v3970_v53 }
 0x60e   : > { %1882 = vmatpush1.bf16.msra.mxu0 %v3975_v60  ;;  %1923 = vmatpush1.bf16.msra.mxu1 %v3985_v48 }
 0x60f   : > { %1883 = vmatprep.subr.bf16.mxu0 %v3980_v44  ;;  %1924 = vmatprep.subr.bf16.mxu1 %v3990_v2 }
 0x612   : > { %1884 = vmatpush1.bf16.msra.mxu0 %v3995_v3  ;;  %1925 = vmatpush1.bf16.msra.mxu1 %v4001_v4 }
 0x613   : > { %1996 = vmatprep.subr.bf16.mxu0 %v3846_v14  ;;  %2037 = vmatprep.subr.bf16.mxu1 %v3859_v55 }
 0x6c8   : > { %v1776_v43 = vpop.f32.mrb[12].mxu0  ;;  %v1817_v23 = vpop.f32.mrb[12].mxu1 }
 0x6c9   : > { %v1824_v25 = vadd.f32 %v1776_v43, %v1738_v46  ;;  %v1778_v28 = vpop.f32.mrb[13].mxu0  ;;  %v1819_v29 = vpop.f32.mrb[13].mxu1  ;;  %v1826_v1 = vadd.f32 %v1817_v23, %v1740_v27 }
 0x6ca   : > { %v1825_v50 = vadd.f32 %v1778_v28, %v1739_v21  ;;  %v1780_v58 = vpop.f32.mrb[14].mxu0  ;;  %v1821_v47 = vpop.f32.mrb[14].mxu1  ;;  %v1827_v57 = vadd.f32 %v1819_v29, %v1741_v52 }
 0x6cb   : > { %v1828_v51 = vpack.c.bf16 %v1824_v25, %v1824_v25  ;;  %v1781_v54 = vpop.f32.mrb[15].mxu0  ;;  %v1822_v0 = vpop.f32.mrb[15].mxu1  ;;  %v1830_v6 = vpack.c.bf16 %v1826_v1, %v1826_v1 }
 0x6cc   : > { %v1829_v5 = vpack.c.bf16 %v1825_v50, %v1825_v50  ;;  %v1831_v9 = vpack.c.bf16 %v1827_v57, %v1827_v57  ;;  %v1867_v57 = vld [vmem:[#allocation2 + $0x90] sm:$0xff] }
 0x6cd   : > { %v2742_v10 = vmul.bf16 3216621497, %v1828_v51  ;;  %v2744_v7 = vmul.bf16 3216621497, %v1830_v6 }
 0x6ce   : > { %v2743_v37 = vmul.bf16 3216621497, %v1829_v5 }
 0x6cf   : > { %2955 = vpow.bf16 %v2742_v10 }
 0x6d0   : > { %2957 = vpow.bf16 %v2743_v37 }
 0x6d1   : > { %2959 = vpow.bf16 %v2744_v7 }
 0x6da   : > { %v2956_v8 = vpop.eup %2955 }
 0x6db   : > { %v1844_v12 = vadd.bf16 1065369472, %v2956_v8  ;;  %v2958_v13 = vpop.eup %2957 }
 0x6dc   : > { %v1845_v16 = vadd.bf16 1065369472, %v2958_v13  ;;  %v2960_v18 = vpop.eup %2959 }
 0x6dd   : > { %2961 = vrcp.bf16 %v1844_v12  ;;  %v1846_v20 = vadd.bf16 1065369472, %v2960_v18 }
 0x6de   : > { %2963 = vtanh.bf16 %v1831_v9 }
 0x6df   : > { %2965 = vrcp.bf16 %v1845_v16 }
 0x6e0   : > { %2967 = vrcp.bf16 %v1846_v20 }
 0x6e8   : > { %v2962_v46 = vpop.eup %2961 }
 0x6e9   : > { %v2964_v21 = vpop.eup %2963  ;;  %v1848_v43 = vmul.bf16 1065369472, %v2962_v46 }
 0x6ea   : > { %v2966_v23 = vpop.eup %2965 }
 0x6eb   : > { %v1850_v25 = vmul.bf16 1065369472, %v2966_v23  ;;  %v1856_v27 = vmul.bf16 %v2964_v21, %v1848_v43  ;;  %v2968_v51 = vpop.eup %2967 }
 0x6ec   : > { %v1852_v54 = vmul.bf16 1065369472, %v2968_v51 }
 0x6ed   : > { %v1854_v28 = vunpack.c.l.bf16 %v1850_v25  ;;  %v1857_v29 = vunpack.c.l.bf16 %v1856_v27 }
 0x6ee   : > { %v1860_v0 = vunpack.c.l.bf16 %v1852_v54 }
 0x6ef   : > { %v1855_v50 = vmul.f32 %v1854_v28, %v4130_v11  ;;  %v1868_v28 = vld [vmem:[#allocation2 + $0x98] sm:$0xff] }
 0x6f1   : > { %v4173_v58 = vadd.f32 %v1857_v29, %v1855_v50 }
 0x6f3   : > { %v2823_v47 = vpack.c.bf16 %v4173_v58, %v4130_v11  ;;  %2969 = vtanh.f32 %v4173_v58  ;;  %v1865_v11 = vld [vmem:[#allocation2 + $0x80] sm:$0xff] }
 0x6f5   : > { %2838 = vst [vmem:[%s3406_s23 + $0x8] sm:$0xff] %v2823_v47  }
 0x6fd   : > { %v2970_v1 = vpop.eup %2969 }
 0x6fe   : > { %v1861_v5 = vmul.f32 %v2970_v1, %v1860_v0 }
 0x700   : > { %1862 = vst [vmem:[#allocation3 + $0x18] sm:$0xff] %v1861_v5  ;;  %v1864_v10 = vpack.c.bf16 %v1861_v5, %v1861_v5  ;;  %v2803_v37 = vpack.c.bf16 %v1861_v5, %v4133_v19  ;;  %v1866_v19 = vld [vmem:[#allocation2 + $0x88] sm:$0xff] }
 0x702   : > { %1902 = vmatmul.mubr.bf16.vlgmr.msra.gmra.mrb[16].mxu0 %v1864_v10  ;;  %2835 = vst [vmem:[%s3401_s21 + $0x8] sm:$0xff] %v2803_v37   ;;  %1943 = vmatmul.mubr.bf16.vlgmr.msra.gmra.mrb[16].mxu1 %v1864_v10 }
 0x703   : > { %1997 = vmatpush1.bf16.msra.mxu0 %v3850_v56  ;;  %2038 = vmatpush1.bf16.msra.mxu1 %v3863_v59 }
 0x704   : > { %1998 = vmatprep.subr.bf16.mxu0 %v3854_v45  ;;  %2039 = vmatprep.subr.bf16.mxu1 %v3872_v34 }
 0x705   : > { %2028 = vmatprep.mubr.bf16.mxu0 %v3172_v36  ;;  %2069 = vmatprep.mubr.bf16.mxu1 %v3172_v36 }
 0x707   : > { %1999 = vmatpush1.bf16.msra.mxu0 %v3868_v32  ;;  %2040 = vmatpush1.bf16.msra.mxu1 %v3883_v33 }
 0x708   : > { %2000 = vmatprep.subr.bf16.mxu0 %v3877_v15  ;;  %2041 = vmatprep.subr.bf16.mxu1 %v3888_v35 }
 0x70b   : > { %2001 = vmatpush1.bf16.msra.mxu0 %v3894_v38  ;;  %2042 = vmatpush1.bf16.msra.mxu1 %v3905_v17 }
 0x70c   : > { %2002 = vmatprep.subr.bf16.mxu0 %v3899_v39  ;;  %2043 = vmatprep.subr.bf16.mxu1 %v3910_v40 }
 0x70f   : > { %2003 = vmatpush1.bf16.msra.mxu0 %v3915_v42  ;;  %2044 = vmatpush1.bf16.msra.mxu1 %v3925_v41 }
 0x710   : > { %2004 = vmatprep.subr.bf16.mxu0 %v3920_v22  ;;  %2045 = vmatprep.subr.bf16.mxu1 %v3930_v24 }
 0x713   : > { %2005 = vmatpush1.bf16.msra.mxu0 %v3935_v26  ;;  %2046 = vmatpush1.bf16.msra.mxu1 %v3945_v61 }
 0x714   : > { %2006 = vmatprep.subr.bf16.mxu0 %v3940_v62  ;;  %2047 = vmatprep.subr.bf16.mxu1 %v3950_v30 }
 0x717   : > { %2007 = vmatpush1.bf16.msra.mxu0 %v3955_v31  ;;  %2048 = vmatpush1.bf16.msra.mxu1 %v3965_v63 }
 0x718   : > { %2008 = vmatprep.subr.bf16.mxu0 %v3960_v49  ;;  %2049 = vmatprep.subr.bf16.mxu1 %v3970_v53 }
 0x71b   : > { %2009 = vmatpush1.bf16.msra.mxu0 %v3975_v60  ;;  %2050 = vmatpush1.bf16.msra.mxu1 %v3985_v48 }
 0x71c   : > { %2010 = vmatprep.subr.bf16.mxu0 %v3980_v44  ;;  %2051 = vmatprep.subr.bf16.mxu1 %v3990_v2 }
 0x71f   : > { %2011 = vmatpush1.bf16.msra.mxu0 %v3995_v3  ;;  %2052 = vmatpush1.bf16.msra.mxu1 %v4001_v4 }
 0x720   : > { %2123 = vmatprep.subr.bf16.mxu0 %v3846_v14  ;;  %2164 = vmatprep.subr.bf16.mxu1 %v3859_v55 }
 0x7d5   : > { %v1903_v6 = vpop.f32.mrb[16].mxu0  ;;  %v1944_v52 = vpop.f32.mrb[16].mxu1 }
 0x7d6   : > { %v1951_v7 = vadd.f32 %v1903_v6, %v1865_v11  ;;  %v1905_v8 = vpop.f32.mrb[17].mxu0  ;;  %v1946_v9 = vpop.f32.mrb[17].mxu1  ;;  %v1953_v21 = vadd.f32 %v1944_v52, %v1867_v57 }
 0x7d7   : > { %v1952_v12 = vadd.f32 %v1905_v8, %v1866_v19  ;;  %v1907_v13 = vpop.f32.mrb[18].mxu0  ;;  %v1948_v16 = vpop.f32.mrb[18].mxu1  ;;  %v1954_v50 = vadd.f32 %v1946_v9, %v1868_v28  ;;  %v1994_v28 = vld [vmem:[#allocation2 + $0xb0] sm:$0xff] }
 0x7d8   : > { %v1955_v18 = vpack.c.bf16 %v1951_v7, %v1951_v7  ;;  %v1908_v20 = vpop.f32.mrb[19].mxu0  ;;  %v1949_v46 = vpop.f32.mrb[19].mxu1  ;;  %v1957_v27 = vpack.c.bf16 %v1953_v21, %v1953_v21 }
 0x7d9   : > { %v1956_v43 = vpack.c.bf16 %v1952_v12, %v1952_v12  ;;  %v1958_v51 = vpack.c.bf16 %v1954_v50, %v1954_v50 }
 0x7da   : > { %v2745_v23 = vmul.bf16 3216621497, %v1955_v18  ;;  %v2747_v29 = vmul.bf16 3216621497, %v1957_v27 }
 0x7db   : > { %v2746_v25 = vmul.bf16 3216621497, %v1956_v43  ;;  %v1993_v43 = vld [vmem:[#allocation2 + $0xa8] sm:$0xff] }
 0x7dc   : > { %2971 = vpow.bf16 %v2745_v23 }
 0x7dd   : > { %2973 = vpow.bf16 %v2746_v25 }
 0x7de   : > { %2975 = vpow.bf16 %v2747_v29 }
 0x7e7   : > { %v2972_v47 = vpop.eup %2971 }
 0x7e8   : > { %v1971_v54 = vadd.bf16 1065369472, %v2972_v47  ;;  %v2974_v0 = vpop.eup %2973 }
 0x7e9   : > { %v1972_v1 = vadd.bf16 1065369472, %v2974_v0  ;;  %v2976_v5 = vpop.eup %2975 }
 0x7ea   : > { %2977 = vrcp.bf16 %v1971_v54  ;;  %v1973_v10 = vadd.bf16 1065369472, %v2976_v5 }
 0x7eb   : > { %2979 = vtanh.bf16 %v1958_v51 }
 0x7ec   : > { %2981 = vrcp.bf16 %v1972_v1 }
 0x7ed   : > { %2983 = vrcp.bf16 %v1973_v10 }
 0x7f5   : > { %v2978_v37 = vpop.eup %2977 }
 0x7f6   : > { %v2980_v11 = vpop.eup %2979  ;;  %v1975_v19 = vmul.bf16 1065369472, %v2978_v37 }
 0x7f7   : > { %v2982_v6 = vpop.eup %2981 }
 0x7f8   : > { %v1977_v52 = vmul.bf16 1065369472, %v2982_v6  ;;  %v1983_v7 = vmul.bf16 %v2980_v11, %v1975_v19  ;;  %v2984_v13 = vpop.eup %2983  ;;  %v1995_v19 = vld [vmem:[#allocation2 + $0xb8] sm:$0xff] }
 0x7f9   : > { %v1979_v16 = vmul.bf16 1065369472, %v2984_v13 }
 0x7fa   : > { %v1981_v57 = vunpack.c.l.bf16 %v1977_v52  ;;  %v1984_v8 = vunpack.c.l.bf16 %v1983_v7 }
 0x7fb   : > { %v1987_v18 = vunpack.c.l.bf16 %v1979_v16 }
 0x7fc   : > { %v1982_v9 = vmul.f32 %v1981_v57, %v4173_v58  ;;  %v1992_v58 = vld [vmem:[#allocation2 + $0xa0] sm:$0xff] }
 0x7fe   : > { %v4216_v12 = vadd.f32 %v1984_v8, %v1982_v9 }
 0x800   : > { %2985 = vtanh.f32 %v4216_v12 }
 0x80a   : > { %v2986_v20 = vpop.eup %2985 }
 0x80b   : > { %v4219_v46 = vmul.f32 %v2986_v20, %v1987_v18 }
 0x80d   : > { %1989 = vst [vmem:[#allocation3 + $0x20] sm:$0xff] %v4219_v46  ;;  %v1991_v21 = vpack.c.bf16 %v4219_v46, %v4219_v46 }
 0x80f   : > { %2029 = vmatmul.mubr.bf16.vlgmr.msra.gmra.mrb[20].mxu0 %v1991_v21  ;;  %2070 = vmatmul.mubr.bf16.vlgmr.msra.gmra.mrb[20].mxu1 %v1991_v21 }
 0x810   : > { %2124 = vmatpush1.bf16.msra.mxu0 %v3850_v56  ;;  %2165 = vmatpush1.bf16.msra.mxu1 %v3863_v59 }
 0x811   : > { %2125 = vmatprep.subr.bf16.mxu0 %v3854_v45  ;;  %2166 = vmatprep.subr.bf16.mxu1 %v3872_v34 }
 0x812   : > { %2155 = vmatprep.mubr.bf16.mxu0 %v3172_v36  ;;  %2196 = vmatprep.mubr.bf16.mxu1 %v3172_v36 }
 0x814   : > { %2126 = vmatpush1.bf16.msra.mxu0 %v3868_v32  ;;  %2167 = vmatpush1.bf16.msra.mxu1 %v3883_v33 }
 0x815   : > { %2127 = vmatprep.subr.bf16.mxu0 %v3877_v15  ;;  %2168 = vmatprep.subr.bf16.mxu1 %v3888_v35 }
 0x818   : > { %2128 = vmatpush1.bf16.msra.mxu0 %v3894_v38  ;;  %2169 = vmatpush1.bf16.msra.mxu1 %v3905_v17 }
 0x819   : > { %2129 = vmatprep.subr.bf16.mxu0 %v3899_v39  ;;  %2170 = vmatprep.subr.bf16.mxu1 %v3910_v40 }
 0x81c   : > { %2130 = vmatpush1.bf16.msra.mxu0 %v3915_v42  ;;  %2171 = vmatpush1.bf16.msra.mxu1 %v3925_v41 }
 0x81d   : > { %2131 = vmatprep.subr.bf16.mxu0 %v3920_v22  ;;  %2172 = vmatprep.subr.bf16.mxu1 %v3930_v24 }
 0x820   : > { %2132 = vmatpush1.bf16.msra.mxu0 %v3935_v26  ;;  %2173 = vmatpush1.bf16.msra.mxu1 %v3945_v61 }
 0x821   : > { %2133 = vmatprep.subr.bf16.mxu0 %v3940_v62  ;;  %2174 = vmatprep.subr.bf16.mxu1 %v3950_v30 }
 0x824   : > { %2134 = vmatpush1.bf16.msra.mxu0 %v3955_v31  ;;  %2175 = vmatpush1.bf16.msra.mxu1 %v3965_v63 }
 0x825   : > { %2135 = vmatprep.subr.bf16.mxu0 %v3960_v49  ;;  %2176 = vmatprep.subr.bf16.mxu1 %v3970_v53 }
 0x828   : > { %2136 = vmatpush1.bf16.msra.mxu0 %v3975_v60  ;;  %2177 = vmatpush1.bf16.msra.mxu1 %v3985_v48 }
 0x829   : > { %2137 = vmatprep.subr.bf16.mxu0 %v3980_v44  ;;  %2178 = vmatprep.subr.bf16.mxu1 %v3990_v2 }
 0x82c   : > { %2138 = vmatpush1.bf16.msra.mxu0 %v3995_v3  ;;  %2179 = vmatpush1.bf16.msra.mxu1 %v4001_v4 }
 0x82d   : > { %2250 = vmatprep.subr.bf16.mxu0 %v3846_v14  ;;  %2291 = vmatprep.subr.bf16.mxu1 %v3859_v55 }
 0x8e2   : > { %v2030_v23 = vpop.f32.mrb[20].mxu0  ;;  %v2071_v25 = vpop.f32.mrb[20].mxu1 }
 0x8e3   : > { %v2078_v27 = vadd.f32 %v2030_v23, %v1992_v58  ;;  %v2032_v29 = vpop.f32.mrb[21].mxu0  ;;  %v2073_v50 = vpop.f32.mrb[21].mxu1  ;;  %v2080_v10 = vadd.f32 %v2071_v25, %v1994_v28 }
 0x8e4   : > { %v2079_v47 = vadd.f32 %v2032_v29, %v1993_v43  ;;  %v2034_v51 = vpop.f32.mrb[22].mxu0  ;;  %v2075_v54 = vpop.f32.mrb[22].mxu1  ;;  %v2081_v52 = vadd.f32 %v2073_v50, %v1995_v19 }
 0x8e5   : > { %v2082_v0 = vpack.c.bf16 %v2078_v27, %v2078_v27  ;;  %v2035_v1 = vpop.f32.mrb[23].mxu0  ;;  %v2076_v5 = vpop.f32.mrb[23].mxu1  ;;  %v2084_v55 = vpack.c.bf16 %v2080_v10, %v2080_v10 }
 0x8e6   : > { %v2083_v37 = vpack.c.bf16 %v2079_v47, %v2079_v47  ;;  %v2085_v57 = vpack.c.bf16 %v2081_v52, %v2081_v52 }
 0x8e7   : > { %v2748_v11 = vmul.bf16 3216621497, %v2082_v0  ;;  %v2750_v6 = vmul.bf16 3216621497, %v2084_v55 }
 0x8e8   : > { %v2749_v14 = vmul.bf16 3216621497, %v2083_v37 }
 0x8e9   : > { %2987 = vpow.bf16 %v2748_v11 }
 0x8ea   : > { %2989 = vpow.bf16 %v2749_v14 }
 0x8eb   : > { %2991 = vpow.bf16 %v2750_v6 }
 0x8f4   : > { %v2988_v7 = vpop.eup %2987 }
 0x8f5   : > { %v2098_v8 = vadd.bf16 1065369472, %v2988_v7  ;;  %v2990_v9 = vpop.eup %2989 }
 0x8f6   : > { %v2099_v13 = vadd.bf16 1065369472, %v2990_v9  ;;  %v2992_v16 = vpop.eup %2991 }
 0x8f7   : > { %2993 = vrcp.bf16 %v2098_v8  ;;  %v2100_v18 = vadd.bf16 1065369472, %v2992_v16 }
 0x8f8   : > { %2995 = vtanh.bf16 %v2085_v57 }
 0x8f9   : > { %2997 = vrcp.bf16 %v2099_v13 }
 0x8fa   : > { %2999 = vrcp.bf16 %v2100_v18  ;;  %v2246_v18 = vld [vmem:[#allocation2 + $0xe0] sm:$0xff] }
 0x902   : > { %v2994_v20 = vpop.eup %2993 }
 0x903   : > { %v2996_v21 = vpop.eup %2995  ;;  %v2102_v58 = vmul.bf16 1065369472, %v2994_v20  ;;  %v2247_v20 = vld [vmem:[#allocation2 + $0xe8] sm:$0xff] }
 0x904   : > { %v2998_v43 = vpop.eup %2997 }
 0x905   : > { %v2104_v23 = vmul.bf16 1065369472, %v2998_v43  ;;  %v2110_v25 = vmul.bf16 %v2996_v21, %v2102_v58  ;;  %v3000_v51 = vpop.eup %2999 }
 0x906   : > { %v2106_v54 = vmul.bf16 1065369472, %v3000_v51 }
 0x907   : > { %v2108_v27 = vunpack.c.l.bf16 %v2104_v23  ;;  %v2111_v28 = vunpack.c.l.bf16 %v2110_v25  ;;  %v2248_v23 = vld [vmem:[#allocation2 + $0xf0] sm:$0xff] }
 0x908   : > { %v2114_v0 = vunpack.c.l.bf16 %v2106_v54 }
 0x909   : > { %v2109_v29 = vmul.f32 %v2108_v27, %v4216_v12 }
 0x90b   : > { %v4259_v50 = vadd.f32 %v2111_v28, %v2109_v29 }
 0x90d   : > { %v2828_v47 = vpack.c.bf16 %v4259_v50, %v4216_v12  ;;  %3001 = vtanh.f32 %v4259_v50 }
 0x90f   : > { %2839 = vst [vmem:[%s3406_s23 + $0x10] sm:$0xff] %v2828_v47  }
 0x917   : > { %v3002_v1 = vpop.eup %3001 }
 0x918   : > { %v2115_v5 = vmul.f32 %v3002_v1, %v2114_v0 }
 0x91a   : > { %2116 = vst [vmem:[#allocation3 + $0x28] sm:$0xff] %v2115_v5  ;;  %v2118_v10 = vpack.c.bf16 %v2115_v5, %v2115_v5  ;;  %v2808_v37 = vpack.c.bf16 %v2115_v5, %v4219_v46 }
 0x91c   : > { %2156 = vmatmul.mubr.bf16.vlgmr.msra.gmra.mrb[24].mxu0 %v2118_v10  ;;  %2836 = vst [vmem:[%s3401_s21 + $0x10] sm:$0xff] %v2808_v37   ;;  %2197 = vmatmul.mubr.bf16.vlgmr.msra.gmra.mrb[24].mxu1 %v2118_v10 }
 0x91d   : > { %2251 = vmatpush1.bf16.msra.mxu0 %v3850_v56  ;;  %2292 = vmatpush1.bf16.msra.mxu1 %v3863_v59  ;;  %v2119_v56 = vld [vmem:[#allocation2 + $0xc0] sm:$0xff] }
 0x91e   : > { %2252 = vmatprep.subr.bf16.mxu0 %v3854_v45  ;;  %2293 = vmatprep.subr.bf16.mxu1 %v3872_v34  ;;  %v2120_v45 = vld [vmem:[#allocation2 + $0xc8] sm:$0xff] }
 0x91f   : > { %2282 = vmatprep.mubr.bf16.mxu0 %v3172_v36  ;;  %2323 = vmatprep.mubr.bf16.mxu1 %v3172_v36 }
 0x921   : > { %2253 = vmatpush1.bf16.msra.mxu0 %v3868_v32  ;;  %2294 = vmatpush1.bf16.msra.mxu1 %v3883_v33 }
 0x922   : > { %2254 = vmatprep.subr.bf16.mxu0 %v3877_v15  ;;  %2295 = vmatprep.subr.bf16.mxu1 %v3888_v35  ;;  %v2121_v15 = vld [vmem:[#allocation2 + $0xd0] sm:$0xff] }
 0x925   : > { %2255 = vmatpush1.bf16.msra.mxu0 %v3894_v38  ;;  %2296 = vmatpush1.bf16.msra.mxu1 %v3905_v17 }
 0x926   : > { %2256 = vmatprep.subr.bf16.mxu0 %v3899_v39  ;;  %2297 = vmatprep.subr.bf16.mxu1 %v3910_v40 }
 0x929   : > { %2257 = vmatpush1.bf16.msra.mxu0 %v3915_v42  ;;  %2298 = vmatpush1.bf16.msra.mxu1 %v3925_v41 }
 0x92a   : > { %2258 = vmatprep.subr.bf16.mxu0 %v3920_v22  ;;  %2299 = vmatprep.subr.bf16.mxu1 %v3930_v24 }
 0x92d   : > { %2259 = vmatpush1.bf16.msra.mxu0 %v3935_v26  ;;  %2300 = vmatpush1.bf16.msra.mxu1 %v3945_v61  ;;  %v2122_v61 = vld [vmem:[#allocation2 + $0xd8] sm:$0xff] }
 0x92e   : > { %2260 = vmatprep.subr.bf16.mxu0 %v3940_v62  ;;  %2301 = vmatprep.subr.bf16.mxu1 %v3950_v30 }
 0x931   : > { %2261 = vmatpush1.bf16.msra.mxu0 %v3955_v31  ;;  %2302 = vmatpush1.bf16.msra.mxu1 %v3965_v63 }
 0x932   : > { %2262 = vmatprep.subr.bf16.mxu0 %v3960_v49  ;;  %2303 = vmatprep.subr.bf16.mxu1 %v3970_v53 }
 0x935   : > { %2263 = vmatpush1.bf16.msra.mxu0 %v3975_v60  ;;  %2304 = vmatpush1.bf16.msra.mxu1 %v3985_v48 }
 0x936   : > { %2264 = vmatprep.subr.bf16.mxu0 %v3980_v44  ;;  %2305 = vmatprep.subr.bf16.mxu1 %v3990_v2 }
 0x939   : > { %2265 = vmatpush1.bf16.msra.mxu0 %v3995_v3  ;;  %2306 = vmatpush1.bf16.msra.mxu1 %v4001_v4 }
 0x9ef   : > { %v2157_v59 = vpop.f32.mrb[24].mxu0  ;;  %v2198_v32 = vpop.f32.mrb[24].mxu1 }
 0x9f0   : > { %v2205_v34 = vadd.f32 %v2157_v59, %v2119_v56  ;;  %v2159_v33 = vpop.f32.mrb[25].mxu0  ;;  %v2200_v35 = vpop.f32.mrb[25].mxu1  ;;  %v2207_v22 = vadd.f32 %v2198_v32, %v2121_v15  ;;  %v2249_v56 = vld [vmem:[#allocation2 + $0xf8] sm:$0xff] }
 0x9f1   : > { %v2206_v36 = vadd.f32 %v2159_v33, %v2120_v45  ;;  %v2161_v38 = vpop.f32.mrb[26].mxu0  ;;  %v2202_v39 = vpop.f32.mrb[26].mxu1  ;;  %v2208_v31 = vadd.f32 %v2200_v35, %v2122_v61 }
 0x9f2   : > { %v2209_v17 = vpack.c.bf16 %v2205_v34, %v2205_v34  ;;  %v2162_v40 = vpop.f32.mrb[27].mxu0  ;;  %v2203_v42 = vpop.f32.mrb[27].mxu1  ;;  %v2211_v62 = vpack.c.bf16 %v2207_v22, %v2207_v22 }
 0x9f3   : > { %v2210_v41 = vpack.c.bf16 %v2206_v36, %v2206_v36  ;;  %v2212_v63 = vpack.c.bf16 %v2208_v31, %v2208_v31 }
 0x9f4   : > { %v2751_v24 = vmul.bf16 3216621497, %v2209_v17  ;;  %v2753_v30 = vmul.bf16 3216621497, %v2211_v62 }
 0x9f5   : > { %v2752_v26 = vmul.bf16 3216621497, %v2210_v41 }
 0x9f6   : > { %3003 = vpow.bf16 %v2751_v24 }
 0x9f7   : > { %3005 = vpow.bf16 %v2752_v26 }
 0x9f8   : > { %3007 = vpow.bf16 %v2753_v30 }
 0xa01   : > { %v3004_v49 = vpop.eup %3003 }
 0xa02   : > { %v2225_v53 = vadd.bf16 1065369472, %v3004_v49  ;;  %v3006_v60 = vpop.eup %3005 }
 0xa03   : > { %v2226_v44 = vadd.bf16 1065369472, %v3006_v60  ;;  %v3008_v48 = vpop.eup %3007 }
 0xa04   : > { %3009 = vrcp.bf16 %v2225_v53  ;;  %v2227_v2 = vadd.bf16 1065369472, %v3008_v48 }
 0xa05   : > { %3011 = vtanh.bf16 %v2212_v63 }
 0xa06   : > { %3013 = vrcp.bf16 %v2226_v44 }
 0xa07   : > { %3015 = vrcp.bf16 %v2227_v2 }
 0xa0f   : > { %v3010_v3 = vpop.eup %3009 }
 0xa10   : > { %v3012_v4 = vpop.eup %3011  ;;  %v2229_v12 = vmul.bf16 1065369472, %v3010_v3 }
 0xa11   : > { %v3014_v46 = vpop.eup %3013 }
 0xa12   : > { %v2231_v11 = vmul.bf16 1065369472, %v3014_v46  ;;  %v2237_v14 = vmul.bf16 %v3012_v4, %v2229_v12  ;;  %v3016_v7 = vpop.eup %3015 }
 0xa13   : > { %v2233_v57 = vmul.bf16 1065369472, %v3016_v7 }
 0xa14   : > { %v2235_v55 = vunpack.c.l.bf16 %v2231_v11  ;;  %v2238_v19 = vunpack.c.l.bf16 %v2237_v14 }
 0xa15   : > { %v2241_v8 = vunpack.c.l.bf16 %v2233_v57 }
 0xa16   : > { %v2236_v6 = vmul.f32 %v2235_v55, %v4259_v50 }
 0xa18   : > { %v2239_v52 = vadd.f32 %v2238_v19, %v2236_v6 }
 0xa1a   : > { %3017 = vtanh.f32 %v2239_v52 }
 0xa24   : > { %v3018_v9 = vpop.eup %3017 }
 0xa25   : > { %v2242_v13 = vmul.f32 %v3018_v9, %v2241_v8 }
 0xa27   : > { %2243 = vst [vmem:[#allocation3 + $0x30] sm:$0xff] %v2242_v13  ;;  %v2245_v16 = vpack.c.bf16 %v2242_v13, %v2242_v13 }
 0xa29   : > { %2283 = vmatmul.mubr.bf16.vlgmr.msra.gmra.mrb[28].mxu0 %v2245_v16  ;;  %2324 = vmatmul.mubr.bf16.vlgmr.msra.gmra.mrb[28].mxu1 %v2245_v16 }
 0xafc   : > { %v2284_v21 = vpop.f32.mrb[28].mxu0  ;;  %v2325_v58 = vpop.f32.mrb[28].mxu1 }
 0xafd   : > { %v2332_v43 = vadd.f32 %v2284_v21, %v2246_v18  ;;  %v2286_v25 = vpop.f32.mrb[29].mxu0  ;;  %v2327_v27 = vpop.f32.mrb[29].mxu1  ;;  %v2334_v0 = vadd.f32 %v2325_v58, %v2248_v23 }
 0xafe   : > { %v2333_v28 = vadd.f32 %v2286_v25, %v2247_v20  ;;  %v2288_v29 = vpop.f32.mrb[30].mxu0  ;;  %v2329_v50 = vpop.f32.mrb[30].mxu1  ;;  %v2335_v59 = vadd.f32 %v2327_v27, %v2249_v56 }
 0xaff   : > { %v2336_v47 = vpack.c.bf16 %v2332_v43, %v2332_v43  ;;  %v2289_v51 = vpop.f32.mrb[31].mxu0  ;;  %v2330_v54 = vpop.f32.mrb[31].mxu1  ;;  %v2338_v37 = vpack.c.bf16 %v2334_v0, %v2334_v0 }
 0xb00   : > { %v2337_v1 = vpack.c.bf16 %v2333_v28, %v2333_v28  ;;  %v2339_v34 = vpack.c.bf16 %v2335_v59, %v2335_v59 }
 0xb01   : > { %v2754_v5 = vmul.bf16 3216621497, %v2336_v47  ;;  %v2756_v45 = vmul.bf16 3216621497, %v2338_v37 }
 0xb02   : > { %v2755_v10 = vmul.bf16 3216621497, %v2337_v1 }
 0xb03   : > { %3019 = vpow.bf16 %v2754_v5 }
 0xb04   : > { %3021 = vpow.bf16 %v2755_v10 }
 0xb05   : > { %3023 = vpow.bf16 %v2756_v45 }
 0xb0e   : > { %v3020_v32 = vpop.eup %3019 }
 0xb0f   : > { %v2352_v15 = vadd.bf16 1065369472, %v3020_v32  ;;  %v3022_v33 = vpop.eup %3021 }
 0xb10   : > { %v2353_v35 = vadd.bf16 1065369472, %v3022_v33  ;;  %v3024_v36 = vpop.eup %3023 }
 0xb11   : > { %3025 = vrcp.bf16 %v2352_v15  ;;  %v2354_v38 = vadd.bf16 1065369472, %v3024_v36 }
 0xb12   : > { %3027 = vtanh.bf16 %v2339_v34 }
 0xb13   : > { %3029 = vrcp.bf16 %v2353_v35 }
 0xb14   : > { %3031 = vrcp.bf16 %v2354_v38 }
 0xb1c   : > { %v3026_v39 = vpop.eup %3025 }
 0xb1d   : > { %v3028_v17 = vpop.eup %3027  ;;  %v2356_v40 = vmul.bf16 1065369472, %v3026_v39 }
 0xb1e   : > { %v3030_v42 = vpop.eup %3029 }
 0xb1f   : > { %v2358_v22 = vmul.bf16 1065369472, %v3030_v42  ;;  %v2364_v41 = vmul.bf16 %v3028_v17, %v2356_v40  ;;  %v3032_v31 = vpop.eup %3031 }
 0xb20   : > { %v2360_v49 = vmul.bf16 1065369472, %v3032_v31 }
 0xb21   : > { %v2362_v24 = vunpack.c.l.bf16 %v2358_v22  ;;  %v2365_v26 = vunpack.c.l.bf16 %v2364_v41 }
 0xb22   : > { %v2368_v63 = vunpack.c.l.bf16 %v2360_v49 }
 0xb23   : > { %v2363_v62 = vmul.f32 %v2362_v24, %v2239_v52 }
 0xb25   : > { %v2366_v61 = vadd.f32 %v2365_v26, %v2363_v62 }
 0xb27   : > { %3033 = vtanh.f32 %v2366_v61  ;;  %v2833_v30 = vpack.c.bf16 %v2366_v61, %v2239_v52 }
 0xb29   : > { %2840 = vst [vmem:[%s3406_s23 + $0x18] sm:$0xff] %v2833_v30  }
 0xb31   : > { %v3034_v53 = vpop.eup %3033 }
 0xb32   : > { %v2369_v60 = vmul.f32 %v3034_v53, %v2368_v63 }
 0xb34   : > { %2370 = vst [vmem:[#allocation3 + $0x38] sm:$0xff] %v2369_v60  ;;  %v2813_v44 = vpack.c.bf16 %v2369_v60, %v2242_v13 }
 0xb36   : > { %2837 = vst [vmem:[%s3401_s21 + $0x18] sm:$0xff] %v2813_v44  }
 0xb37 PF: > { %p17_p6 = scmp.ge.s32.totalorder %s3224_s22, 4   ;;  %s4395_s18 = smov %s3153_s19 }
 0xb38   : > { %s4396_s19 = smov %s3157_s20  ;;  %s4397_s20 = smov %s3234_s25 }
 0xb39   : > { %s4398_s21 = smov %s3224_s22  ;;  %19 = sbr.rel (!%p17_p6) target bundleno = 4 (0x4), region = 115 }
 0xb40   :  { %2505 = vsyncpa [#allocation6], 1 }
 0xb41   :  { %2507 = vsyncpa [#allocation6 + $0x1], 1 }
 0xb42   :  { %2508 = vsyncpa [#allocation8], 1 }
 0xb43   :  { %2510 = vsyncpa [#allocation8 + $0x1], 1 }

</bundles_post_ra>
